<compile_context>
chip_gen: v7x
topology: tpu7x:2x2x1
jax: 0.10.0
libtpu: 0.0.40
codegen_flags: <defaults>
</compile_context>

<pallas_src>
from functools import partial

import numpy as np
import jax
import jax.numpy as jnp
from jax import lax
from jax.experimental import pallas as pl
from jax.experimental.pallas import tpu as pltpu

HIDDEN = 64        # hidden_size fixed inside the module
NLAYERS = 2        # num_layers fixed inside the module
NOUT_PAD = 128     # lane-padded logit width (real nout sliced out in wrapper)
BATCH_PAD = 8      # sublane-padded batch


# ----------------------------- Pallas kernel ---------------------------------
def classifier_kernel(x_ref,        # ((T+1)*Bp, Fa)   time-major, flattened, +1s column
                      wproj_ref,    # (Fa, 8H)  interleaved [Wih0 | 0] with bias row [b0|b1]
                      wcomb_ref,    # (2H, 8H)  interleaved [[Whh0|Wih1]; [0|Whh1]]
                      fcw_ref,      # (2H, NOUT_PAD)  BN-folded classifier weight
                      fcb_ref,      # (1, NOUT_PAD)   BN-folded bias (-1e30 in padded lanes)
                      out_ref,      # (Bp, NOUT_PAD)  softmax output
                      addend_ref,   # VMEM scratch ((T+1)*Bp, 8H)
                      *, seq_len):
    H = HIDDEN
    H2 = 2 * H
    Bp = out_ref.shape[0]
    T = seq_len

    # ---- hoisted projection: x-proj + b0 (layer-0 lanes) and b1 (layer-1 lanes) ----
    # Stored in VMEM scratch so the (T+1)*Bp x 8H slab is never live in vregs across
    # the unrolled recurrence; each step re-loads only its (Bp, 8H) slice.
    addend_ref[...] = jnp.dot(x_ref[...], wproj_ref[...],
                              preferred_element_type=jnp.float32)

    lane = lax.broadcasted_iota(jnp.int32, (Bp, H2), 1)
    is_l0 = lane < H                                   # layer-0 half of a (Bp, 2H) slab

    def act_slab(gates, c_slab):
        # gates: (Bp, 8H), columns in interleaved order [i0,i1,f0,f1,g0,g1,o0,o1]
        # c_slab/h_slab: (Bp, 2H) = [layer0 | layer1]
        i_f = jax.nn.sigmoid(gates[:, 0 * H2:2 * H2])          # [i | f] slabs
        o = jax.nn.sigmoid(gates[:, 3 * H2:4 * H2])
        g = jnp.tanh(gates[:, 2 * H2:3 * H2])
        c_new = i_f[:, H2:2 * H2] * c_slab + i_f[:, 0:H2] * g
        h_new = o * jnp.tanh(c_new)
        return h_new, c_new

    # ---- prologue: layer-0 at t=0 (h0_init = c_init = 0 => no recurrent matmul);
    #      the layer-1 half of the result is garbage (bias-only) -> masked back to 0.
    h_slab, c_slab = act_slab(addend_ref[0:Bp, :],
                              jnp.zeros((Bp, H2), jnp.float32))
    h_slab = jnp.where(is_l0, h_slab, 0.0)
    c_slab = jnp.where(is_l0, c_slab, 0.0)

    # ---- wavefront recurrence: one fused MXU push per step.
    # At loop entry of iteration t: h_slab = [h0_t | h1_{t-1}], c_slab = [c0_t | c1_{t-1}].
    # G's layer-0 lanes = h0_t @ Whh0 (gates for layer-0 step t+1),
    # G's layer-1 lanes = h0_t @ Wih1 + h1_{t-1} @ Whh1 (gates for layer-1 step t).
    h_prev = h_slab
    for t in range(T):
        if t == T - 1:
            h_prev = h_slab                           # keep h0_{T-1} before it is overwritten
        g = jnp.dot(h_slab, wcomb_ref[...],           # weight indexed in-loop: streamed, not pinned
                    preferred_element_type=jnp.float32)
        gates = g + addend_ref[(t + 1) * Bp:(t + 2) * Bp, :]
        h_slab, c_slab = act_slab(gates, c_slab)

    # torch.cat((hidden[-2], hidden[-1]), dim=1) = [h0_{T-1} | h1_{T-1}]
    hid = jnp.where(is_l0, h_prev, h_slab)

    # BatchNorm is pre-folded into fcw/fcb; padded bias lanes hold -1e30 so they
    # underflow to exact 0 under softmax (F.softmax on 2-D input defaults to dim=1).
    logits = jnp.dot(hid, fcw_ref[...],
                     preferred_element_type=jnp.float32) + fcb_ref[...]
    m = jnp.max(logits, axis=1, keepdims=True)
    e = jnp.exp(logits - m)
    denom = jnp.sum(e, axis=1, keepdims=True)
    out_ref[...] = e * pl.reciprocal(denom, approx=False)


# ------------------------- one-time weight preparation -------------------------
def prepare_params(params, nout=2):
    """Fold/pack the torch-style parameters into the 4 weight slabs the kernel needs.
    Runs once per model, NOT per inference call."""
    H = HIDDEN
    F = params["w_ih0"].shape[0]
    Fa = ((F + 1 + 7) // 8) * 8           # +1 bias column, padded to full sublanes

    def interleave(w_l0, w_l1):
        # (rows, 4H) x 2 in [i,f,g,o] order -> (rows, 8H) in [i0,i1,f0,f1,g0,g1,o0,o1]
        blocks = []
        for gi in range(4):
            blocks.append(w_l0[:, gi * H:(gi + 1) * H])
            blocks.append(w_l1[:, gi * H:(gi + 1) * H])
        return jnp.concatenate(blocks, axis=1)

    zeros_f = jnp.zeros((F, 4 * H), jnp.float32)
    wproj = jnp.concatenate([
        interleave(params["w_ih0"], zeros_f),                 # x rows
        interleave(params["b0"], params["b1"]),               # bias row (hit by the 1s column)
        jnp.zeros((Fa - F - 1, 8 * H), jnp.float32),          # K-padding rows
    ], axis=0)                                                # (Fa, 8H)

    zeros_h = jnp.zeros((H, 4 * H), jnp.float32)
    wcomb = jnp.concatenate([
        interleave(params["w_hh0"], params["w_ih1"]),         # h0 rows
        interleave(zeros_h, params["w_hh1"]),                 # h1 rows
    ], axis=0)                                                # (2H, 8H)

    # fold eval-mode BatchNorm into the classifier head:
    #   (x*scale + shift) @ W + b  ==  x @ (scale.T * W) + (shift @ W + b)
    fc_w = params["bn_scale"].T * params["fc_w"]              # (2H, nout)
    fc_b = params["bn_shift"] @ params["fc_w"] + params["fc_b"]
    fc_w = jnp.pad(fc_w, ((0, 0), (0, NOUT_PAD - nout)))
    fc_b = jnp.pad(fc_b, ((0, 0), (0, NOUT_PAD - nout)), constant_values=-1e30)

    return dict(wproj=wproj, wcomb=wcomb, fc_w=fc_w, fc_b=fc_b)


# ------------------------------- wrapper --------------------------------------
@partial(jax.jit, static_argnames=("nout",))
def classifier_forward(x, kp, *, nout):
    """x: (batch, seq_len, sf_size) float32 -> (batch, nout) softmax probs."""
    B, T, F = x.shape
    H = HIDDEN
    Fa = kp["wproj"].shape[0]
    Bp = max(BATCH_PAD, ((B + 7) // 8) * 8)

    # per-call input plumbing only: time-major, pad batch to 8 sublanes, add one extra
    # (zero) timestep for the wavefront tail, append the constant-1 bias column and the
    # feature padding, then flatten to 2-D for the hoisted in-kernel projection.
    x_tm = jnp.transpose(x, (1, 0, 2))                               # (T, B, F)
    x_tm = jnp.pad(x_tm, ((0, 1), (0, Bp - B), (0, 0)))              # (T+1, Bp, F)
    parts = [x_tm, jnp.ones((T + 1, Bp, 1), x.dtype)]                # bias column = 1 everywhere
    if Fa > F + 1:
        parts.append(jnp.zeros((T + 1, Bp, Fa - F - 1), x.dtype))
    x_aug = jnp.concatenate(parts, axis=-1).reshape((T + 1) * Bp, Fa)

    def full2(shape):
        return pl.BlockSpec(shape, lambda i: (0, 0))

    out = pl.pallas_call(
        partial(classifier_kernel, seq_len=T),
        out_shape=jax.ShapeDtypeStruct((Bp, NOUT_PAD), jnp.float32),
        grid_spec=pltpu.PrefetchScalarGridSpec(
            num_scalar_prefetch=0,
            grid=(1,),                                               # single invocation
            in_specs=[
                full2(((T + 1) * Bp, Fa)),                           # x (augmented, flattened)
                full2((Fa, 8 * H)),                                  # Wproj (+bias row)
                full2((2 * H, 8 * H)),                               # fused Wcomb
                full2((2 * H, NOUT_PAD)),                            # BN-folded fc weight
                full2((1, NOUT_PAD)),                                # BN-folded fc bias
            ],
            out_specs=full2((Bp, NOUT_PAD)),
            scratch_shapes=[pltpu.VMEM(((T + 1) * Bp, 8 * H), jnp.float32)],
        ),
        compiler_params=pltpu.CompilerParams(
            dimension_semantics=("arbitrary",)),
    )(x_aug, kp["wproj"], kp["wcomb"], kp["fc_w"], kp["fc_b"])
    return out[:B, :nout]


# ------------------------- deterministic parameters ---------------------------
def init_params(key, sf_size, nout=2, eps=1e-5):
    H = HIDDEN
    ks = jax.random.split(key, 12)
    k_lstm = 1.0 / np.sqrt(H)

    def u(k, shape, bound):
        return jax.random.uniform(k, shape, jnp.float32, -bound, bound)

    # LSTM layer 0 (input size = sf_size) and layer 1 (input size = H).
    # Stored pre-transposed so the math is x @ W; gate order [i, f, g, o].
    w_ih0 = u(ks[0], (sf_size, 4 * H), k_lstm)
    w_hh0 = u(ks[1], (H, 4 * H), k_lstm)
    b0 = (u(ks[2], (1, 4 * H), k_lstm) + u(ks[3], (1, 4 * H), k_lstm))  # b_ih + b_hh
    w_ih1 = u(ks[4], (H, 4 * H), k_lstm)
    w_hh1 = u(ks[5], (H, 4 * H), k_lstm)
    b1 = (u(ks[6], (1, 4 * H), k_lstm) + u(ks[7], (1, 4 * H), k_lstm))

    # BatchNorm1d(2H) eval-mode: running_mean=0, running_var=1 (PyTorch defaults),
    # gamma/beta drawn deterministically; folded into scale/shift.
    gamma = u(ks[8], (1, 2 * H), 1.0) + 1.0
    beta = u(ks[9], (1, 2 * H), 0.1)
    running_mean = jnp.zeros((1, 2 * H), jnp.float32)
    running_var = jnp.ones((1, 2 * H), jnp.float32)
    bn_scale = gamma / jnp.sqrt(running_var + eps)
    bn_shift = beta - running_mean * bn_scale

    # Linear(2H -> nout)
    k_fc = 1.0 / np.sqrt(2 * H)
    fc_w = u(ks[10], (2 * H, nout), k_fc)
    fc_b = u(ks[11], (1, nout), k_fc)

    return dict(w_ih0=w_ih0, w_hh0=w_hh0, b0=b0,
                w_ih1=w_ih1, w_hh1=w_hh1, b1=b1,
                bn_scale=bn_scale, bn_shift=bn_shift,
                fc_w=fc_w, fc_b=fc_b)


# ----------------------------- pure-JAX reference -----------------------------
def reference_forward(x, params):
    H = HIDDEN
    B, T, F = x.shape
    x_tm = jnp.transpose(x, (1, 0, 2))

    def cell(xt, h, c, wih, whh, b):
        gates = xt @ wih + h @ whh + b
        i = jax.nn.sigmoid(gates[:, 0 * H:1 * H])
        f = jax.nn.sigmoid(gates[:, 1 * H:2 * H])
        g = jnp.tanh(gates[:, 2 * H:3 * H])
        o = jax.nn.sigmoid(gates[:, 3 * H:4 * H])
        c_new = f * c + i * g
        return o * jnp.tanh(c_new), c_new

    def step(carry, xt):
        h0, c0, h1, c1 = carry
        h0, c0 = cell(xt, h0, c0, params["w_ih0"], params["w_hh0"], params["b0"])
        h1, c1 = cell(h0, h1, c1, params["w_ih1"], params["w_hh1"], params["b1"])
        return (h0, c0, h1, c1), None

    z = jnp.zeros((B, H), jnp.float32)
    (h0, _, h1, _), _ = lax.scan(step, (z, z, z, z), x_tm)
    hid = jnp.concatenate([h0, h1], axis=1)
    hid = hid * params["bn_scale"] + params["bn_shift"]
    logits = hid @ params["fc_w"] + params["fc_b"]
    return jax.nn.softmax(logits, axis=1)


# ----------------------------------- main --------------------------------------
if __name__ == "__main__":
    B, T, F_IN, NOUT = 4, 8, 16, 2       # batch, seq_len, sf_size, nout
    key = jax.random.PRNGKey(0)
    k_x, k_p = jax.random.split(key)
    x = jax.random.normal(k_x, (B, T, F_IN), jnp.float32)
    params = init_params(k_p, sf_size=F_IN, nout=NOUT)

    # one-time weight preparation (wavefront fusion, bias/BN folding, padding)
    kparams = jax.tree_util.tree_map(jax.block_until_ready,
                                     prepare_params(params, nout=NOUT))

    y = classifier_forward(x, kparams, nout=NOUT)
    y = jax.block_until_ready(y)

    y_ref = jax.block_until_ready(reference_forward(x, params))
    np.testing.assert_allclose(np.asarray(y), np.asarray(y_ref),
                               rtol=1e-3, atol=1e-3)
    assert y.shape == (B, NOUT)
    np.testing.assert_allclose(np.asarray(y).sum(axis=1), np.ones(B), atol=1e-5)

    print("KERNEL_OK")
</pallas_src>

<mosaic_0001>
module attributes {stable_mosaic.version = 11 : i64} {
  func.func @classifier_kernel(%arg0: i32, %arg1: memref<72x24xf32, #tpu.memory_space<vmem>>, %arg2: memref<24x512xf32, #tpu.memory_space<vmem>>, %arg3: memref<128x512xf32, #tpu.memory_space<vmem>>, %arg4: memref<128x128xf32, #tpu.memory_space<vmem>>, %arg5: memref<1x128xf32, #tpu.memory_space<vmem>>, %arg6: memref<8x128xf32, #tpu.memory_space<vmem>>, %arg7: memref<72x512xf32, #tpu.memory_space<vmem>>) attributes {dimension_semantics = [#tpu.dimension_semantics<arbitrary>], iteration_bounds = array<i64: 1>, scalar_prefetch = 0 : i64, scratch_operands = 1 : i64, tpu.core_type = #tpu.core_type<tc>, window_params = [{pipeline_mode = #tpu.pipeline_mode<synchronous>, transform_indices = @transform_0, window_bounds = array<i64: 72, 24>}, {pipeline_mode = #tpu.pipeline_mode<synchronous>, transform_indices = @transform_1, window_bounds = array<i64: 24, 512>}, {pipeline_mode = #tpu.pipeline_mode<synchronous>, transform_indices = @transform_2, window_bounds = array<i64: 128, 512>}, {pipeline_mode = #tpu.pipeline_mode<synchronous>, transform_indices = @transform_3, window_bounds = array<i64: 128, 128>}, {pipeline_mode = #tpu.pipeline_mode<synchronous>, transform_indices = @transform_4, window_bounds = array<i64: 1, 128>}, {pipeline_mode = #tpu.pipeline_mode<synchronous>, transform_indices = @transform_5, window_bounds = array<i64: 8, 128>}]} {
    %c0 = arith.constant 0 : index
    %c0_0 = arith.constant 0 : index
    %0 = vector.load %arg1[%c0, %c0_0] : memref<72x24xf32, #tpu.memory_space<vmem>>, vector<72x24xf32>
    %c0_1 = arith.constant 0 : index
    %c0_2 = arith.constant 0 : index
    %1 = vector.load %arg2[%c0_1, %c0_2] : memref<24x512xf32, #tpu.memory_space<vmem>>, vector<24x512xf32>
    %cst = arith.constant dense<0.000000e+00> : vector<72x512xf32>
    %2 = tpu.matmul %0, %1, %cst {dimension_numbers = #tpu.dot_dimension_numbers<[1], [0], [0], [1], [0, 0, 1, 1], [], []>} : vector<72x24xf32>, vector<24x512xf32>, vector<72x512xf32> -> vector<72x512xf32>
    %c0_3 = arith.constant 0 : index
    %c0_4 = arith.constant 0 : index
    %3 = vector.load %arg7[%c0_3, %c0_4] : memref<72x512xf32, #tpu.memory_space<vmem>>, vector<72x512xf32>
    tpu.vector_store %arg7[%c0_3, %c0_4], %2 {strides = array<i32>} : memref<72x512xf32, #tpu.memory_space<vmem>>, vector<72x512xf32>,
    %4 = tpu.iota {dimensions = array<i32: 1>} : vector<8x128xi32>
    %c64_i32 = arith.constant 64 : i32
    %5 = vector.broadcast %c64_i32 : i32 to vector<8x128xi32>
    %6 = arith.cmpi slt, %4, %5 : vector<8x128xi32>
    %c0_5 = arith.constant 0 : index
    %c0_6 = arith.constant 0 : index
    %7 = vector.load %arg7[%c0_5, %c0_6] : memref<72x512xf32, #tpu.memory_space<vmem>>, vector<8x512xf32>
    %cst_7 = arith.constant 0.000000e+00 : f32
    %8 = vector.broadcast %cst_7 : f32 to vector<8x128xf32>
    %9 = vector.extract_strided_slice %7 {offsets = [0, 0], sizes = [8, 256], strides = [1, 1]} : vector<8x512xf32> to vector<8x256xf32>
    %10 = arith.negf %9 : vector<8x256xf32>
    %11 = math.exp %10 : vector<8x256xf32>
    %cst_8 = arith.constant 1.000000e+00 : f32
    %12 = vector.broadcast %cst_8 : f32 to vector<8x256xf32>
    %13 = arith.addf %12, %11 : vector<8x256xf32>
    %14 = arith.divf %12, %13 : vector<8x256xf32>
    %15 = vector.extract_strided_slice %7 {offsets = [0, 384], sizes = [8, 128], strides = [1, 1]} : vector<8x512xf32> to vector<8x128xf32>
    %16 = arith.negf %15 : vector<8x128xf32>
    %17 = math.exp %16 : vector<8x128xf32>
    %cst_9 = arith.constant 1.000000e+00 : f32
    %18 = vector.broadcast %cst_9 : f32 to vector<8x128xf32>
    %19 = arith.addf %18, %17 : vector<8x128xf32>
    %20 = arith.divf %18, %19 : vector<8x128xf32>
    %21 = vector.extract_strided_slice %7 {offsets = [0, 256], sizes = [8, 128], strides = [1, 1]} : vector<8x512xf32> to vector<8x128xf32>
    %22 = math.tanh %21 : vector<8x128xf32>
    %23 = vector.extract_strided_slice %14 {offsets = [0, 128], sizes = [8, 128], strides = [1, 1]} : vector<8x256xf32> to vector<8x128xf32>
    %24 = arith.mulf %23, %8 : vector<8x128xf32>
    %25 = vector.extract_strided_slice %14 {offsets = [0, 0], sizes = [8, 128], strides = [1, 1]} : vector<8x256xf32> to vector<8x128xf32>
    %26 = arith.mulf %25, %22 : vector<8x128xf32>
    %27 = arith.addf %24, %26 : vector<8x128xf32>
    %28 = math.tanh %27 : vector<8x128xf32>
    %29 = arith.mulf %20, %28 : vector<8x128xf32>
    %cst_10 = arith.constant 0.000000e+00 : f32
    %30 = vector.broadcast %cst_10 : f32 to vector<8x128xf32>
    %31 = arith.select %6, %29, %30 : vector<8x128xi1>, vector<8x128xf32>
    %cst_11 = arith.constant 0.000000e+00 : f32
    %32 = vector.broadcast %cst_11 : f32 to vector<8x128xf32>
    %33 = arith.select %6, %27, %32 : vector<8x128xi1>, vector<8x128xf32>
    %c0_12 = arith.constant 0 : index
    %c0_13 = arith.constant 0 : index
    %34 = vector.load %arg3[%c0_12, %c0_13] : memref<128x512xf32, #tpu.memory_space<vmem>>, vector<128x512xf32>
    %cst_14 = arith.constant dense<0.000000e+00> : vector<8x512xf32>
    %35 = tpu.matmul %31, %34, %cst_14 {dimension_numbers = #tpu.dot_dimension_numbers<[1], [0], [0], [1], [0, 0, 1, 1], [], []>} : vector<8x128xf32>, vector<128x512xf32>, vector<8x512xf32> -> vector<8x512xf32>
    %c8 = arith.constant 8 : index
    %c0_15 = arith.constant 0 : index
    %36 = vector.load %arg7[%c8, %c0_15] : memref<72x512xf32, #tpu.memory_space<vmem>>, vector<8x512xf32>
    %37 = arith.addf %35, %36 : vector<8x512xf32>
    %38 = vector.extract_strided_slice %37 {offsets = [0, 0], sizes = [8, 256], strides = [1, 1]} : vector<8x512xf32> to vector<8x256xf32>
    %39 = arith.negf %38 : vector<8x256xf32>
    %40 = math.exp %39 : vector<8x256xf32>
    %cst_16 = arith.constant 1.000000e+00 : f32
    %41 = vector.broadcast %cst_16 : f32 to vector<8x256xf32>
    %42 = arith.addf %41, %40 : vector<8x256xf32>
    %43 = arith.divf %41, %42 : vector<8x256xf32>
    %44 = vector.extract_strided_slice %37 {offsets = [0, 384], sizes = [8, 128], strides = [1, 1]} : vector<8x512xf32> to vector<8x128xf32>
    %45 = arith.negf %44 : vector<8x128xf32>
    %46 = math.exp %45 : vector<8x128xf32>
    %cst_17 = arith.constant 1.000000e+00 : f32
    %47 = vector.broadcast %cst_17 : f32 to vector<8x128xf32>
    %48 = arith.addf %47, %46 : vector<8x128xf32>
    %49 = arith.divf %47, %48 : vector<8x128xf32>
    %50 = vector.extract_strided_slice %37 {offsets = [0, 256], sizes = [8, 128], strides = [1, 1]} : vector<8x512xf32> to vector<8x128xf32>
    %51 = math.tanh %50 : vector<8x128xf32>
    %52 = vector.extract_strided_slice %43 {offsets = [0, 128], sizes = [8, 128], strides = [1, 1]} : vector<8x256xf32> to vector<8x128xf32>
    %53 = arith.mulf %52, %33 : vector<8x128xf32>
    %54 = vector.extract_strided_slice %43 {offsets = [0, 0], sizes = [8, 128], strides = [1, 1]} : vector<8x256xf32> to vector<8x128xf32>
    %55 = arith.mulf %54, %51 : vector<8x128xf32>
    %56 = arith.addf %53, %55 : vector<8x128xf32>
    %57 = math.tanh %56 : vector<8x128xf32>
    %58 = arith.mulf %49, %57 : vector<8x128xf32>
    %c0_18 = arith.constant 0 : index
    %c0_19 = arith.constant 0 : index
    %59 = vector.load %arg3[%c0_18, %c0_19] : memref<128x512xf32, #tpu.memory_space<vmem>>, vector<128x512xf32>
    %cst_20 = arith.constant dense<0.000000e+00> : vector<8x512xf32>
    %60 = tpu.matmul %58, %59, %cst_20 {dimension_numbers = #tpu.dot_dimension_numbers<[1], [0], [0], [1], [0, 0, 1, 1], [], []>} : vector<8x128xf32>, vector<128x512xf32>, vector<8x512xf32> -> vector<8x512xf32>
    %c16 = arith.constant 16 : index
    %c0_21 = arith.constant 0 : index
    %61 = vector.load %arg7[%c16, %c0_21] : memref<72x512xf32, #tpu.memory_space<vmem>>, vector<8x512xf32>
    %62 = arith.addf %60, %61 : vector<8x512xf32>
    %63 = vector.extract_strided_slice %62 {offsets = [0, 0], sizes = [8, 256], strides = [1, 1]} : vector<8x512xf32> to vector<8x256xf32>
    %64 = arith.negf %63 : vector<8x256xf32>
    %65 = math.exp %64 : vector<8x256xf32>
    %cst_22 = arith.constant 1.000000e+00 : f32
    %66 = vector.broadcast %cst_22 : f32 to vector<8x256xf32>
    %67 = arith.addf %66, %65 : vector<8x256xf32>
    %68 = arith.divf %66, %67 : vector<8x256xf32>
    %69 = vector.extract_strided_slice %62 {offsets = [0, 384], sizes = [8, 128], strides = [1, 1]} : vector<8x512xf32> to vector<8x128xf32>
    %70 = arith.negf %69 : vector<8x128xf32>
    %71 = math.exp %70 : vector<8x128xf32>
    %cst_23 = arith.constant 1.000000e+00 : f32
    %72 = vector.broadcast %cst_23 : f32 to vector<8x128xf32>
    %73 = arith.addf %72, %71 : vector<8x128xf32>
    %74 = arith.divf %72, %73 : vector<8x128xf32>
    %75 = vector.extract_strided_slice %62 {offsets = [0, 256], sizes = [8, 128], strides = [1, 1]} : vector<8x512xf32> to vector<8x128xf32>
    %76 = math.tanh %75 : vector<8x128xf32>
    %77 = vector.extract_strided_slice %68 {offsets = [0, 128], sizes = [8, 128], strides = [1, 1]} : vector<8x256xf32> to vector<8x128xf32>
    %78 = arith.mulf %77, %56 : vector<8x128xf32>
    %79 = vector.extract_strided_slice %68 {offsets = [0, 0], sizes = [8, 128], strides = [1, 1]} : vector<8x256xf32> to vector<8x128xf32>
    %80 = arith.mulf %79, %76 : vector<8x128xf32>
    %81 = arith.addf %78, %80 : vector<8x128xf32>
    %82 = math.tanh %81 : vector<8x128xf32>
    %83 = arith.mulf %74, %82 : vector<8x128xf32>
    %c0_24 = arith.constant 0 : index
    %c0_25 = arith.constant 0 : index
    %84 = vector.load %arg3[%c0_24, %c0_25] : memref<128x512xf32, #tpu.memory_space<vmem>>, vector<128x512xf32>
    %cst_26 = arith.constant dense<0.000000e+00> : vector<8x512xf32>
    %85 = tpu.matmul %83, %84, %cst_26 {dimension_numbers = #tpu.dot_dimension_numbers<[1], [0], [0], [1], [0, 0, 1, 1], [], []>} : vector<8x128xf32>, vector<128x512xf32>, vector<8x512xf32> -> vector<8x512xf32>
    %c24 = arith.constant 24 : index
    %c0_27 = arith.constant 0 : index
    %86 = vector.load %arg7[%c24, %c0_27] : memref<72x512xf32, #tpu.memory_space<vmem>>, vector<8x512xf32>
    %87 = arith.addf %85, %86 : vector<8x512xf32>
    %88 = vector.extract_strided_slice %87 {offsets = [0, 0], sizes = [8, 256], strides = [1, 1]} : vector<8x512xf32> to vector<8x256xf32>
    %89 = arith.negf %88 : vector<8x256xf32>
    %90 = math.exp %89 : vector<8x256xf32>
    %cst_28 = arith.constant 1.000000e+00 : f32
    %91 = vector.broadcast %cst_28 : f32 to vector<8x256xf32>
    %92 = arith.addf %91, %90 : vector<8x256xf32>
    %93 = arith.divf %91, %92 : vector<8x256xf32>
    %94 = vector.extract_strided_slice %87 {offsets = [0, 384], sizes = [8, 128], strides = [1, 1]} : vector<8x512xf32> to vector<8x128xf32>
    %95 = arith.negf %94 : vector<8x128xf32>
    %96 = math.exp %95 : vector<8x128xf32>
    %cst_29 = arith.constant 1.000000e+00 : f32
    %97 = vector.broadcast %cst_29 : f32 to vector<8x128xf32>
    %98 = arith.addf %97, %96 : vector<8x128xf32>
    %99 = arith.divf %97, %98 : vector<8x128xf32>
    %100 = vector.extract_strided_slice %87 {offsets = [0, 256], sizes = [8, 128], strides = [1, 1]} : vector<8x512xf32> to vector<8x128xf32>
    %101 = math.tanh %100 : vector<8x128xf32>
    %102 = vector.extract_strided_slice %93 {offsets = [0, 128], sizes = [8, 128], strides = [1, 1]} : vector<8x256xf32> to vector<8x128xf32>
    %103 = arith.mulf %102, %81 : vector<8x128xf32>
    %104 = vector.extract_strided_slice %93 {offsets = [0, 0], sizes = [8, 128], strides = [1, 1]} : vector<8x256xf32> to vector<8x128xf32>
    %105 = arith.mulf %104, %101 : vector<8x128xf32>
    %106 = arith.addf %103, %105 : vector<8x128xf32>
    %107 = math.tanh %106 : vector<8x128xf32>
    %108 = arith.mulf %99, %107 : vector<8x128xf32>
    %c0_30 = arith.constant 0 : index
    %c0_31 = arith.constant 0 : index
    %109 = vector.load %arg3[%c0_30, %c0_31] : memref<128x512xf32, #tpu.memory_space<vmem>>, vector<128x512xf32>
    %cst_32 = arith.constant dense<0.000000e+00> : vector<8x512xf32>
    %110 = tpu.matmul %108, %109, %cst_32 {dimension_numbers = #tpu.dot_dimension_numbers<[1], [0], [0], [1], [0, 0, 1, 1], [], []>} : vector<8x128xf32>, vector<128x512xf32>, vector<8x512xf32> -> vector<8x512xf32>
    %c32 = arith.constant 32 : index
    %c0_33 = arith.constant 0 : index
    %111 = vector.load %arg7[%c32, %c0_33] : memref<72x512xf32, #tpu.memory_space<vmem>>, vector<8x512xf32>
    %112 = arith.addf %110, %111 : vector<8x512xf32>
    %113 = vector.extract_strided_slice %112 {offsets = [0, 0], sizes = [8, 256], strides = [1, 1]} : vector<8x512xf32> to vector<8x256xf32>
    %114 = arith.negf %113 : vector<8x256xf32>
    %115 = math.exp %114 : vector<8x256xf32>
    %cst_34 = arith.constant 1.000000e+00 : f32
    %116 = vector.broadcast %cst_34 : f32 to vector<8x256xf32>
    %117 = arith.addf %116, %115 : vector<8x256xf32>
    %118 = arith.divf %116, %117 : vector<8x256xf32>
    %119 = vector.extract_strided_slice %112 {offsets = [0, 384], sizes = [8, 128], strides = [1, 1]} : vector<8x512xf32> to vector<8x128xf32>
    %120 = arith.negf %119 : vector<8x128xf32>
    %121 = math.exp %120 : vector<8x128xf32>
    %cst_35 = arith.constant 1.000000e+00 : f32
    %122 = vector.broadcast %cst_35 : f32 to vector<8x128xf32>
    %123 = arith.addf %122, %121 : vector<8x128xf32>
    %124 = arith.divf %122, %123 : vector<8x128xf32>
    %125 = vector.extract_strided_slice %112 {offsets = [0, 256], sizes = [8, 128], strides = [1, 1]} : vector<8x512xf32> to vector<8x128xf32>
    %126 = math.tanh %125 : vector<8x128xf32>
    %127 = vector.extract_strided_slice %118 {offsets = [0, 128], sizes = [8, 128], strides = [1, 1]} : vector<8x256xf32> to vector<8x128xf32>
    %128 = arith.mulf %127, %106 : vector<8x128xf32>
    %129 = vector.extract_strided_slice %118 {offsets = [0, 0], sizes = [8, 128], strides = [1, 1]} : vector<8x256xf32> to vector<8x128xf32>
    %130 = arith.mulf %129, %126 : vector<8x128xf32>
    %131 = arith.addf %128, %130 : vector<8x128xf32>
    %132 = math.tanh %131 : vector<8x128xf32>
    %133 = arith.mulf %124, %132 : vector<8x128xf32>
    %c0_36 = arith.constant 0 : index
    %c0_37 = arith.constant 0 : index
    %134 = vector.load %arg3[%c0_36, %c0_37] : memref<128x512xf32, #tpu.memory_space<vmem>>, vector<128x512xf32>
    %cst_38 = arith.constant dense<0.000000e+00> : vector<8x512xf32>
    %135 = tpu.matmul %133, %134, %cst_38 {dimension_numbers = #tpu.dot_dimension_numbers<[1], [0], [0], [1], [0, 0, 1, 1], [], []>} : vector<8x128xf32>, vector<128x512xf32>, vector<8x512xf32> -> vector<8x512xf32>
    %c40 = arith.constant 40 : index
    %c0_39 = arith.constant 0 : index
    %136 = vector.load %arg7[%c40, %c0_39] : memref<72x512xf32, #tpu.memory_space<vmem>>, vector<8x512xf32>
    %137 = arith.addf %135, %136 : vector<8x512xf32>
    %138 = vector.extract_strided_slice %137 {offsets = [0, 0], sizes = [8, 256], strides = [1, 1]} : vector<8x512xf32> to vector<8x256xf32>
    %139 = arith.negf %138 : vector<8x256xf32>
    %140 = math.exp %139 : vector<8x256xf32>
    %cst_40 = arith.constant 1.000000e+00 : f32
    %141 = vector.broadcast %cst_40 : f32 to vector<8x256xf32>
    %142 = arith.addf %141, %140 : vector<8x256xf32>
    %143 = arith.divf %141, %142 : vector<8x256xf32>
    %144 = vector.extract_strided_slice %137 {offsets = [0, 384], sizes = [8, 128], strides = [1, 1]} : vector<8x512xf32> to vector<8x128xf32>
    %145 = arith.negf %144 : vector<8x128xf32>
    %146 = math.exp %145 : vector<8x128xf32>
    %cst_41 = arith.constant 1.000000e+00 : f32
    %147 = vector.broadcast %cst_41 : f32 to vector<8x128xf32>
    %148 = arith.addf %147, %146 : vector<8x128xf32>
    %149 = arith.divf %147, %148 : vector<8x128xf32>
    %150 = vector.extract_strided_slice %137 {offsets = [0, 256], sizes = [8, 128], strides = [1, 1]} : vector<8x512xf32> to vector<8x128xf32>
    %151 = math.tanh %150 : vector<8x128xf32>
    %152 = vector.extract_strided_slice %143 {offsets = [0, 128], sizes = [8, 128], strides = [1, 1]} : vector<8x256xf32> to vector<8x128xf32>
    %153 = arith.mulf %152, %131 : vector<8x128xf32>
    %154 = vector.extract_strided_slice %143 {offsets = [0, 0], sizes = [8, 128], strides = [1, 1]} : vector<8x256xf32> to vector<8x128xf32>
    %155 = arith.mulf %154, %151 : vector<8x128xf32>
    %156 = arith.addf %153, %155 : vector<8x128xf32>
    %157 = math.tanh %156 : vector<8x128xf32>
    %158 = arith.mulf %149, %157 : vector<8x128xf32>
    %c0_42 = arith.constant 0 : index
    %c0_43 = arith.constant 0 : index
    %159 = vector.load %arg3[%c0_42, %c0_43] : memref<128x512xf32, #tpu.memory_space<vmem>>, vector<128x512xf32>
    %cst_44 = arith.constant dense<0.000000e+00> : vector<8x512xf32>
    %160 = tpu.matmul %158, %159, %cst_44 {dimension_numbers = #tpu.dot_dimension_numbers<[1], [0], [0], [1], [0, 0, 1, 1], [], []>} : vector<8x128xf32>, vector<128x512xf32>, vector<8x512xf32> -> vector<8x512xf32>
    %c48 = arith.constant 48 : index
    %c0_45 = arith.constant 0 : index
    %161 = vector.load %arg7[%c48, %c0_45] : memref<72x512xf32, #tpu.memory_space<vmem>>, vector<8x512xf32>
    %162 = arith.addf %160, %161 : vector<8x512xf32>
    %163 = vector.extract_strided_slice %162 {offsets = [0, 0], sizes = [8, 256], strides = [1, 1]} : vector<8x512xf32> to vector<8x256xf32>
    %164 = arith.negf %163 : vector<8x256xf32>
    %165 = math.exp %164 : vector<8x256xf32>
    %cst_46 = arith.constant 1.000000e+00 : f32
    %166 = vector.broadcast %cst_46 : f32 to vector<8x256xf32>
    %167 = arith.addf %166, %165 : vector<8x256xf32>
    %168 = arith.divf %166, %167 : vector<8x256xf32>
    %169 = vector.extract_strided_slice %162 {offsets = [0, 384], sizes = [8, 128], strides = [1, 1]} : vector<8x512xf32> to vector<8x128xf32>
    %170 = arith.negf %169 : vector<8x128xf32>
    %171 = math.exp %170 : vector<8x128xf32>
    %cst_47 = arith.constant 1.000000e+00 : f32
    %172 = vector.broadcast %cst_47 : f32 to vector<8x128xf32>
    %173 = arith.addf %172, %171 : vector<8x128xf32>
    %174 = arith.divf %172, %173 : vector<8x128xf32>
    %175 = vector.extract_strided_slice %162 {offsets = [0, 256], sizes = [8, 128], strides = [1, 1]} : vector<8x512xf32> to vector<8x128xf32>
    %176 = math.tanh %175 : vector<8x128xf32>
    %177 = vector.extract_strided_slice %168 {offsets = [0, 128], sizes = [8, 128], strides = [1, 1]} : vector<8x256xf32> to vector<8x128xf32>
    %178 = arith.mulf %177, %156 : vector<8x128xf32>
    %179 = vector.extract_strided_slice %168 {offsets = [0, 0], sizes = [8, 128], strides = [1, 1]} : vector<8x256xf32> to vector<8x128xf32>
    %180 = arith.mulf %179, %176 : vector<8x128xf32>
    %181 = arith.addf %178, %180 : vector<8x128xf32>
    %182 = math.tanh %181 : vector<8x128xf32>
    %183 = arith.mulf %174, %182 : vector<8x128xf32>
    %c0_48 = arith.constant 0 : index
    %c0_49 = arith.constant 0 : index
    %184 = vector.load %arg3[%c0_48, %c0_49] : memref<128x512xf32, #tpu.memory_space<vmem>>, vector<128x512xf32>
    %cst_50 = arith.constant dense<0.000000e+00> : vector<8x512xf32>
    %185 = tpu.matmul %183, %184, %cst_50 {dimension_numbers = #tpu.dot_dimension_numbers<[1], [0], [0], [1], [0, 0, 1, 1], [], []>} : vector<8x128xf32>, vector<128x512xf32>, vector<8x512xf32> -> vector<8x512xf32>
    %c56 = arith.constant 56 : index
    %c0_51 = arith.constant 0 : index
    %186 = vector.load %arg7[%c56, %c0_51] : memref<72x512xf32, #tpu.memory_space<vmem>>, vector<8x512xf32>
    %187 = arith.addf %185, %186 : vector<8x512xf32>
    %188 = vector.extract_strided_slice %187 {offsets = [0, 0], sizes = [8, 256], strides = [1, 1]} : vector<8x512xf32> to vector<8x256xf32>
    %189 = arith.negf %188 : vector<8x256xf32>
    %190 = math.exp %189 : vector<8x256xf32>
    %cst_52 = arith.constant 1.000000e+00 : f32
    %191 = vector.broadcast %cst_52 : f32 to vector<8x256xf32>
    %192 = arith.addf %191, %190 : vector<8x256xf32>
    %193 = arith.divf %191, %192 : vector<8x256xf32>
    %194 = vector.extract_strided_slice %187 {offsets = [0, 384], sizes = [8, 128], strides = [1, 1]} : vector<8x512xf32> to vector<8x128xf32>
    %195 = arith.negf %194 : vector<8x128xf32>
    %196 = math.exp %195 : vector<8x128xf32>
    %cst_53 = arith.constant 1.000000e+00 : f32
    %197 = vector.broadcast %cst_53 : f32 to vector<8x128xf32>
    %198 = arith.addf %197, %196 : vector<8x128xf32>
    %199 = arith.divf %197, %198 : vector<8x128xf32>
    %200 = vector.extract_strided_slice %187 {offsets = [0, 256], sizes = [8, 128], strides = [1, 1]} : vector<8x512xf32> to vector<8x128xf32>
    %201 = math.tanh %200 : vector<8x128xf32>
    %202 = vector.extract_strided_slice %193 {offsets = [0, 128], sizes = [8, 128], strides = [1, 1]} : vector<8x256xf32> to vector<8x128xf32>
    %203 = arith.mulf %202, %181 : vector<8x128xf32>
    %204 = vector.extract_strided_slice %193 {offsets = [0, 0], sizes = [8, 128], strides = [1, 1]} : vector<8x256xf32> to vector<8x128xf32>
    %205 = arith.mulf %204, %201 : vector<8x128xf32>
    %206 = arith.addf %203, %205 : vector<8x128xf32>
    %207 = math.tanh %206 : vector<8x128xf32>
    %208 = arith.mulf %199, %207 : vector<8x128xf32>
    %c0_54 = arith.constant 0 : index
    %c0_55 = arith.constant 0 : index
    %209 = vector.load %arg3[%c0_54, %c0_55] : memref<128x512xf32, #tpu.memory_space<vmem>>, vector<128x512xf32>
    %cst_56 = arith.constant dense<0.000000e+00> : vector<8x512xf32>
    %210 = tpu.matmul %208, %209, %cst_56 {dimension_numbers = #tpu.dot_dimension_numbers<[1], [0], [0], [1], [0, 0, 1, 1], [], []>} : vector<8x128xf32>, vector<128x512xf32>, vector<8x512xf32> -> vector<8x512xf32>
    %c64 = arith.constant 64 : index
    %c0_57 = arith.constant 0 : index
    %211 = vector.load %arg7[%c64, %c0_57] : memref<72x512xf32, #tpu.memory_space<vmem>>, vector<8x512xf32>
    %212 = arith.addf %210, %211 : vector<8x512xf32>
    %213 = vector.extract_strided_slice %212 {offsets = [0, 0], sizes = [8, 256], strides = [1, 1]} : vector<8x512xf32> to vector<8x256xf32>
    %214 = arith.negf %213 : vector<8x256xf32>
    %215 = math.exp %214 : vector<8x256xf32>
    %cst_58 = arith.constant 1.000000e+00 : f32
    %216 = vector.broadcast %cst_58 : f32 to vector<8x256xf32>
    %217 = arith.addf %216, %215 : vector<8x256xf32>
    %218 = arith.divf %216, %217 : vector<8x256xf32>
    %219 = vector.extract_strided_slice %212 {offsets = [0, 384], sizes = [8, 128], strides = [1, 1]} : vector<8x512xf32> to vector<8x128xf32>
    %220 = arith.negf %219 : vector<8x128xf32>
    %221 = math.exp %220 : vector<8x128xf32>
    %cst_59 = arith.constant 1.000000e+00 : f32
    %222 = vector.broadcast %cst_59 : f32 to vector<8x128xf32>
    %223 = arith.addf %222, %221 : vector<8x128xf32>
    %224 = arith.divf %222, %223 : vector<8x128xf32>
    %225 = vector.extract_strided_slice %212 {offsets = [0, 256], sizes = [8, 128], strides = [1, 1]} : vector<8x512xf32> to vector<8x128xf32>
    %226 = math.tanh %225 : vector<8x128xf32>
    %227 = vector.extract_strided_slice %218 {offsets = [0, 128], sizes = [8, 128], strides = [1, 1]} : vector<8x256xf32> to vector<8x128xf32>
    %228 = arith.mulf %227, %206 : vector<8x128xf32>
    %229 = vector.extract_strided_slice %218 {offsets = [0, 0], sizes = [8, 128], strides = [1, 1]} : vector<8x256xf32> to vector<8x128xf32>
    %230 = arith.mulf %229, %226 : vector<8x128xf32>
    %231 = arith.addf %228, %230 : vector<8x128xf32>
    %232 = math.tanh %231 : vector<8x128xf32>
    %233 = arith.mulf %224, %232 : vector<8x128xf32>
    %234 = arith.select %6, %208, %233 : vector<8x128xi1>, vector<8x128xf32>
    %c0_60 = arith.constant 0 : index
    %c0_61 = arith.constant 0 : index
    %235 = vector.load %arg4[%c0_60, %c0_61] : memref<128x128xf32, #tpu.memory_space<vmem>>, vector<128x128xf32>
    %cst_62 = arith.constant dense<0.000000e+00> : vector<8x128xf32>
    %236 = tpu.matmul %234, %235, %cst_62 {dimension_numbers = #tpu.dot_dimension_numbers<[1], [0], [0], [1], [0, 0, 1, 1], [], []>} : vector<8x128xf32>, vector<128x128xf32>, vector<8x128xf32> -> vector<8x128xf32>
    %c0_63 = arith.constant 0 : index
    %c0_64 = arith.constant 0 : index
    %237 = vector.load %arg5[%c0_63, %c0_64] : memref<1x128xf32, #tpu.memory_space<vmem>>, vector<1x128xf32>
    %238 = vector.broadcast %237 : vector<1x128xf32> to vector<8x128xf32>
    %239 = arith.addf %236, %238 : vector<8x128xf32>
    %cst_65 = arith.constant dense<0xFF800000> : vector<8xf32>
    %240 = vector.multi_reduction <maximumf>, %239, %cst_65 [1] : vector<8x128xf32> to vector<8xf32>
    %241 = vector.shape_cast %240 : vector<8xf32> to vector<8x1xf32>
    %242 = vector.broadcast %241 : vector<8x1xf32> to vector<8x128xf32>
    %243 = arith.subf %239, %242 : vector<8x128xf32>
    %244 = math.exp %243 : vector<8x128xf32>
    %cst_66 = arith.constant dense<0.000000e+00> : vector<8xf32>
    %245 = vector.multi_reduction <add>, %244, %cst_66 [1] : vector<8x128xf32> to vector<8xf32>
    %246 = vector.shape_cast %245 : vector<8xf32> to vector<8x1xf32>
    %247 = tpu.reciprocal %246 : vector<8x1xf32> -> vector<8x1xf32>
    %248 = vector.broadcast %247 : vector<8x1xf32> to vector<8x128xf32>
    %249 = arith.mulf %244, %248 : vector<8x128xf32>
    %c0_67 = arith.constant 0 : index
    %c0_68 = arith.constant 0 : index
    %250 = vector.load %arg6[%c0_67, %c0_68] : memref<8x128xf32, #tpu.memory_space<vmem>>, vector<8x128xf32>
    tpu.vector_store %arg6[%c0_67, %c0_68], %249 {strides = array<i32>} : memref<8x128xf32, #tpu.memory_space<vmem>>, vector<8x128xf32>,
    return
  }
  func.func @transform_0(%arg0: i32) -> (i32, i32) {
    %c0_i32 = arith.constant 0 : i32
    %c0_i32_0 = arith.constant 0 : i32
    %c0_i32_1 = arith.constant 0 : i32
    return %c0_i32, %c0_i32_0 : i32, i32
  }
  func.func @transform_1(%arg0: i32) -> (i32, i32) {
    %c0_i32 = arith.constant 0 : i32
    %c0_i32_0 = arith.constant 0 : i32
    %c0_i32_1 = arith.constant 0 : i32
    return %c0_i32, %c0_i32_0 : i32, i32
  }
  func.func @transform_2(%arg0: i32) -> (i32, i32) {
    %c0_i32 = arith.constant 0 : i32
    %c0_i32_0 = arith.constant 0 : i32
    %c0_i32_1 = arith.constant 0 : i32
    return %c0_i32, %c0_i32_0 : i32, i32
  }
  func.func @transform_3(%arg0: i32) -> (i32, i32) {
    %c0_i32 = arith.constant 0 : i32
    %c0_i32_0 = arith.constant 0 : i32
    %c0_i32_1 = arith.constant 0 : i32
    return %c0_i32, %c0_i32_0 : i32, i32
  }
  func.func @transform_4(%arg0: i32) -> (i32, i32) {
    %c0_i32 = arith.constant 0 : i32
    %c0_i32_0 = arith.constant 0 : i32
    %c0_i32_1 = arith.constant 0 : i32
    return %c0_i32, %c0_i32_0 : i32, i32
  }
  func.func @transform_5(%arg0: i32) -> (i32, i32) {
    %c0_i32 = arith.constant 0 : i32
    %c0_i32_0 = arith.constant 0 : i32
    %c0_i32_1 = arith.constant 0 : i32
    return %c0_i32, %c0_i32_0 : i32, i32
  }
}

</mosaic_0001>

<bundles_post_ra>
// kernel: classifier_forward.1
= control target key start
LH: loop header
LB: loop body
LE: loop exit
PB: predicated region body
PF: predicated region fallthrough
CT: control target
= control target key end

     0   :  { %10 = vsyncpa [#allocation4], 0  ;;  %s2781_s18 = smov [#allocation3]   ;;  %s3377_s0 = inlined_call_operand.vmem [shape: f32[72,24], index: 0, kind: input, shape index: {}]   ;;  %s3378_s1 = inlined_call_operand.vmem [shape: f32[24,512], index: 1, kind: input, shape index: {}]   ;;  %s3379_s2 = inlined_call_operand.hbm [shape: f32[128,512], index: 2, kind: input, shape index: {}]   ;;  %s3380_s3 = inlined_call_operand.vmem [shape: f32[128,128], index: 3, kind: input, shape index: {}]   ;;  %s3381_s4 = inlined_call_operand.vmem [shape: f32[1,128], index: 4, kind: input, shape index: {}]   ;;  %s3382_s5 = inlined_call_operand.vmem [shape: f32[8,128], index: 5, kind: output, shape index: {}]  }
   0x1   :  { %s20_s19 = sshll.u32 %s2781_s18, 4  ;;  %s2757_s22 = scalar_lea.hbm %s3379_s2, 8192  ;;  %s21_s19 = int_to_ptr.vmem [resolvable:$true] %s20_s19 }
   0x2   :  { %p2758_p0 = scmp.ne.s32.totalorder %s3379_s2, %s2757_s22  ;;  %p2761_p1 = scmp.lt.u32.totalorder %s2757_s22, %s3379_s2 }
   0x4   :  { %p2763_p2 = pnand %p2761_p1, %p2758_p0 }
   0x6   :  { %2766 = shalt.err (!%p2763_p2)
}
   0x7   :  { %s2767_s27 = scalar_lea.vmem %s21_s19, 8192  ;;  %p2772_p4 = scmp.lt.s32.totalorder %s21_s19, %s21_s19 }
   0x8   :  { %p2768_p3 = scmp.ne.s32.totalorder %s21_s19, %s2767_s27  ;;  %p2773_p5 = scmp.lt.s32.totalorder %s2767_s27, %s2767_s27 }
   0xa   :  { %p2774_p6 = por %p2773_p5, %p2772_p4 }
   0xc   :  { %p2775_p7 = pnand %p2774_p6, %p2768_p3 }
   0xe   :  { %2778 = shalt.err (!%p2775_p7)
}
   0xf   :  { %s2782_s28 = smov 512   ;;  %s2783_s29 = smov 32  }
  0x10   :  { %26 = dma.hbm_to_vmem [thread:$0]  %s3379_s2, 8192, %s21_s19, [#allocation4], %s2782_s28, %s2782_s28, %s2783_s29  }
  0x11   :  { %2779 = dma.done.wait [#allocation4], 8192  }
  0x12   :  { %2780 = vsyncadd [#allocation4], 4294959104  ;;  %v2784_v0 = vmov 0.0   ;;  %v44_v1 = vld [vmem:[%s3378_s1 + $0x8] sm:$0xff]  ;;  %v43_v3 = vld [vmem:[%s3378_s1] sm:$0xff]  ;;  %vm55_vm0 = vcmask 195584  }
  0x13   :  { %147 = vmatprep.mubr.f32.mxu0 %v2784_v0  ;;  %195 = vmatprep.mubr.f32.mxu1 %v2784_v0  ;;  %v48_v2 = vld [vmem:[%s3378_s1 + $0x28] sm:$0xff]  ;;  %v47_v5 = vld [vmem:[%s3378_s1 + $0x20] sm:$0xff]  ;;  %v46_v8 = vld [vmem:[%s3378_s1 + $0x18] sm:$0xff]  ;;  %vm2786_vm2 = vmmov 0  }
  0x14   :  { %v2023_v4 = vpack.c.bf16 %v48_v2, %v44_v1  ;;  %v2025_v6 = vpack.c.bf16 %v47_v5, %v43_v3  ;;  %v52_v7 = vld [vmem:[%s3378_s1 + $0x48] sm:$0xff]  ;;  %v50_v9 = vld [vmem:[%s3378_s1 + $0x38] sm:$0xff]  ;;  %v45_v10 = vld [vmem:[%s3378_s1 + $0x10] sm:$0xff] }
  0x15   :  { %v49_v11 = vld [vmem:[%s3378_s1 + $0x30] sm:$0xff]  ;;  %v51_v12 = vld [vmem:[%s3378_s1 + $0x40] sm:$0xff]  ;;  %v2027_v15 = vpack.c.bf16 %v50_v9, %v46_v8  ;;  %v54_v17 = vld [vmem:[%s3378_s1 + $0x58] sm:$0xff] }
  0x16   :  { %2024 = vmatprep.subr.bf16.mxu0 %v2023_v4  ;;  %2567 = vmatprep.subr.bf16.mxu1 %v2023_v4  ;;  %v34_v13 = vld [vmem:[%s3377_s0] sm:$0xff]  ;;  %v2029_v16 = vpack.c.bf16 %v49_v11, %v45_v10  ;;  %v53_v18 = vld [vmem:[%s3378_s1 + $0x50] sm:$0xff]  ;;  %v391_v19 = vld [vmem:[#allocation3 + $0x8] sm:$0xff] }
  0x17   :  { %2026 = vmatpush1.bf16.msra.mxu0 %v2025_v6  ;;  %2569 = vmatpush1.bf16.msra.mxu1 %v2025_v6  ;;  %v2867_v14 = vld [vmem:[%s3377_s0 + $0x40] sm:$0xff]  ;;  %v395_v20 = vld [vmem:[#allocation3 + $0x28] sm:$0xff]  ;;  %v393_v21 = vld [vmem:[#allocation3 + $0x18] sm:$0xff] }
  0x18   :  { %87 = vmatprep.subr.mxu0 %v52_v7  ;;  %2568 = vmatprep.subr.mxu1 %v52_v7  ;;  %v2882_v22 = vpack.c.bf16 %v395_v20, %v391_v19  ;;  %v390_v23 = vld [vmem:[#allocation3] sm:$0xff]  ;;  %v397_v25 = vld [vmem:[#allocation3 + $0x38] sm:$0xff]  ;;  %v35_v26 = vld [vmem:[%s3377_s0 + $0x8] sm:$0xff] }
  0x19   :  { %v394_v24 = vld [vmem:[#allocation3 + $0x20] sm:$0xff]  ;;  %v2889_v28 = vpack.c.bf16 %v397_v25, %v393_v21  ;;  %v392_v29 = vld [vmem:[#allocation3 + $0x10] sm:$0xff]  ;;  %v399_v32 = vld [vmem:[#allocation3 + $0x48] sm:$0xff] }
  0x1a   :  { %v2887_v27 = vpack.c.bf16 %v394_v24, %v390_v23  ;;  %v396_v30 = vld [vmem:[#allocation3 + $0x30] sm:$0xff]  ;;  %v403_v33 = vld [vmem:[#allocation3 + $0x68] sm:$0xff]  ;;  %v401_v34 = vld [vmem:[#allocation3 + $0x58] sm:$0xff] }
  0x1b   :  { %88 = vmatpush1.msra.mxu0 %v51_v12  ;;  %2570 = vmatpush1.msra.mxu1 %v51_v12  ;;  %v2893_v31 = vpack.c.bf16 %v396_v30, %v392_v29  ;;  %v2899_v35 = vpack.c.bf16 %v403_v33, %v399_v32  ;;  %v398_v36 = vld [vmem:[#allocation3 + $0x40] sm:$0xff]  ;;  %v405_v38 = vld [vmem:[#allocation3 + $0x78] sm:$0xff]  ;;  %v36_v39 = vld [vmem:[%s3377_s0 + $0x10] sm:$0xff] }
  0x1c   :  { %1923 = vmatmul.mubr.msk.f32.vlgmr.msra.gmra.mrb[0].mxu0 %vm55_vm0, %v34_v13  ;;  %1931 = vmatmul.mubr.msk.f32.vlgmr.msra.gmra.mrb[0].mxu1 %vm55_vm0, %v2867_v14  ;;  %v402_v37 = vld [vmem:[#allocation3 + $0x60] sm:$0xff]  ;;  %v2907_v41 = vpack.c.bf16 %v405_v38, %v401_v34  ;;  %v400_v42 = vld [vmem:[#allocation3 + $0x50] sm:$0xff]  ;;  %v407_v45 = vld [vmem:[#allocation3 + $0x88] sm:$0xff] }
  0x1d   :  { %2028 = vmatprep.subr.bf16.mxu1 %v2027_v15  ;;  %266 = vmatprep.mubr.f32.mxu1 %v2784_v0  ;;  %v2905_v40 = vpack.c.bf16 %v402_v37, %v398_v36  ;;  %v404_v43 = vld [vmem:[#allocation3 + $0x70] sm:$0xff]  ;;  %v411_v46 = vld [vmem:[#allocation3 + $0xa8] sm:$0xff]  ;;  %v409_v47 = vld [vmem:[#allocation3 + $0x98] sm:$0xff] }
  0x1e   :  { %2030 = vmatpush1.bf16.msra.mxu1 %v2029_v16  ;;  %153 = vmatprep.mubr.f32.mxu0 %v2784_v0  ;;  %v2911_v44 = vpack.c.bf16 %v404_v43, %v400_v42  ;;  %v2917_v48 = vpack.c.bf16 %v411_v46, %v407_v45  ;;  %v406_v49 = vld [vmem:[#allocation3 + $0x80] sm:$0xff]  ;;  %v413_v51 = vld [vmem:[#allocation3 + $0xb8] sm:$0xff]  ;;  %v408_v55 = vld [vmem:[#allocation3 + $0x90] sm:$0xff] }
  0x1f   :  { %206 = vmatprep.subr.mxu1 %v54_v17  ;;  %2032 = vmatprep.subr.bf16.mxu0 %v2882_v22  ;;  %v410_v50 = vld [vmem:[#allocation3 + $0xa0] sm:$0xff]  ;;  %v37_v52 = vld [vmem:[%s3377_s0 + $0x18] sm:$0xff]  ;;  %v2926_v54 = vpack.c.bf16 %v413_v51, %v409_v47  ;;  %v412_v56 = vld [vmem:[#allocation3 + $0xb0] sm:$0xff] }
  0x20   :  { %2034 = vmatpush1.bf16.msra.mxu0 %v2887_v27  ;;  %v2924_v53 = vpack.c.bf16 %v410_v50, %v406_v49  ;;  %v2930_v57 = vpack.c.bf16 %v412_v56, %v408_v55  ;;  %v415_v58 = vld [vmem:[#allocation3 + $0xc8] sm:$0xff]  ;;  %v417_v60 = vld [vmem:[#allocation3 + $0xd8] sm:$0xff]  ;;  %v414_v62 = vld [vmem:[#allocation3 + $0xc0] sm:$0xff] }
  0x21   :  { %1924 = vmatmul.mubr.msk.f32.gmra.mrb[2].mxu0 %vm55_vm0, %v35_v26  ;;  %2036 = vmatprep.subr.bf16.mxu0 %v2899_v35  ;;  %v419_v59 = vld [vmem:[#allocation3 + $0xe8] sm:$0xff]  ;;  %v418_v63 = vld [vmem:[#allocation3 + $0xe0] sm:$0xff]  ;;  %v421_v1 = vld [vmem:[#allocation3 + $0xf8] sm:$0xff] }
  0x22   :  { %207 = vmatpush1.msra.mxu1 %v53_v18  ;;  %159 = vmatprep.mubr.f32.mxu0 %v2784_v0  ;;  %v2936_v61 = vpack.c.bf16 %v419_v59, %v415_v58  ;;  %v38_v2 = vld [vmem:[%s3377_s0 + $0x20] sm:$0xff]  ;;  %v2943_v3 = vpack.c.bf16 %v418_v63, %v414_v62  ;;  %v2945_v4 = vpack.c.bf16 %v421_v1, %v417_v60  ;;  %v416_v5 = vld [vmem:[#allocation3 + $0xd0] sm:$0xff]  ;;  %v423_v8 = vld [vmem:[#allocation3 + $0x108] sm:$0xff] }
  0x23   :  { %1932 = vmatmul.mubr.msk.f32.vlgmr.msra.gmra.mrb[2].mxu1 %vm55_vm0, %v34_v13  ;;  %2064 = vmatprep.subr.bf16.mxu1 %v2889_v28  ;;  %v420_v6 = vld [vmem:[#allocation3 + $0xf0] sm:$0xff]  ;;  %v427_v9 = vld [vmem:[#allocation3 + $0x128] sm:$0xff]  ;;  %v425_v10 = vld [vmem:[#allocation3 + $0x118] sm:$0xff] }
  0x24   :  { %272 = vmatprep.mubr.f32.mxu1 %v2784_v0  ;;  %2066 = vmatpush1.bf16.msra.mxu1 %v2893_v31  ;;  %v2949_v7 = vpack.c.bf16 %v420_v6, %v416_v5  ;;  %v2955_v11 = vpack.c.bf16 %v427_v9, %v423_v8  ;;  %v422_v12 = vld [vmem:[#allocation3 + $0x100] sm:$0xff]  ;;  %v429_v15 = vld [vmem:[#allocation3 + $0x138] sm:$0xff]  ;;  %v39_v16 = vld [vmem:[%s3377_s0 + $0x28] sm:$0xff] }
  0x25   :  { %2038 = vmatpush1.bf16.msra.mxu0 %v2905_v40  ;;  %2068 = vmatprep.subr.bf16.mxu1 %v2907_v41  ;;  %v426_v13 = vld [vmem:[#allocation3 + $0x120] sm:$0xff]  ;;  %v2964_v18 = vpack.c.bf16 %v429_v15, %v425_v10  ;;  %v424_v19 = vld [vmem:[#allocation3 + $0x110] sm:$0xff]  ;;  %v431_v23 = vld [vmem:[#allocation3 + $0x148] sm:$0xff] }
  0x26   :  { %1925 = vmatmul.mubr.msk.f32.gmra.mrb[4].mxu0 %vm55_vm0, %v36_v39  ;;  %2040 = vmatprep.subr.bf16.mxu0 %v2917_v48  ;;  %v2962_v17 = vpack.c.bf16 %v426_v13, %v422_v12  ;;  %v428_v20 = vld [vmem:[#allocation3 + $0x130] sm:$0xff]  ;;  %v435_v24 = vld [vmem:[#allocation3 + $0x168] sm:$0xff]  ;;  %v433_v25 = vld [vmem:[#allocation3 + $0x158] sm:$0xff] }
  0x27   :  { %1933 = vmatmul.mubr.msk.f32.gmra.mrb[4].mxu1 %vm55_vm0, %v35_v26  ;;  %165 = vmatprep.mubr.f32.mxu0 %v2784_v0  ;;  %v2968_v21 = vpack.c.bf16 %v428_v20, %v424_v19  ;;  %v2974_v26 = vpack.c.bf16 %v435_v24, %v431_v23  ;;  %v430_v29 = vld [vmem:[#allocation3 + $0x140] sm:$0xff]  ;;  %v437_v32 = vld [vmem:[#allocation3 + $0x178] sm:$0xff]  ;;  %v40_v33 = vld [vmem:[%s3377_s0 + $0x30] sm:$0xff] }
  0x28   :  { %278 = vmatprep.mubr.f32.mxu1 %v2784_v0  ;;  %2070 = vmatpush1.bf16.msra.mxu1 %v2911_v44  ;;  %v434_v30 = vld [vmem:[#allocation3 + $0x160] sm:$0xff]  ;;  %v2983_v36 = vpack.c.bf16 %v437_v32, %v433_v25  ;;  %v432_v37 = vld [vmem:[#allocation3 + $0x150] sm:$0xff]  ;;  %v439_v42 = vld [vmem:[#allocation3 + $0x188] sm:$0xff] }
  0x29   :  { %2042 = vmatpush1.bf16.msra.mxu0 %v2924_v53  ;;  %2072 = vmatprep.subr.bf16.mxu1 %v2926_v54  ;;  %v2981_v34 = vpack.c.bf16 %v434_v30, %v430_v29  ;;  %v436_v38 = vld [vmem:[#allocation3 + $0x170] sm:$0xff]  ;;  %v443_v43 = vld [vmem:[#allocation3 + $0x1a8] sm:$0xff]  ;;  %v441_v45 = vld [vmem:[#allocation3 + $0x198] sm:$0xff] }
  0x2a   :  { %1926 = vmatmul.mubr.msk.f32.gmra.mrb[6].mxu0 %vm55_vm0, %v37_v52  ;;  %2044 = vmatprep.subr.bf16.mxu0 %v2936_v61  ;;  %v2993_v46 = vpack.c.bf16 %v443_v43, %v439_v42  ;;  %v438_v47 = vld [vmem:[#allocation3 + $0x180] sm:$0xff]  ;;  %v445_v50 = vld [vmem:[#allocation3 + $0x1b8] sm:$0xff]  ;;  %v440_v56 = vld [vmem:[#allocation3 + $0x190] sm:$0xff] }
  0x2b   :  { %1934 = vmatmul.mubr.msk.f32.gmra.mrb[6].mxu1 %vm55_vm0, %v36_v39  ;;  %171 = vmatprep.mubr.f32.mxu0 %v2784_v0  ;;  %v2987_v39 = vpack.c.bf16 %v436_v38, %v432_v37  ;;  %v442_v49 = vld [vmem:[#allocation3 + $0x1a0] sm:$0xff]  ;;  %v41_v51 = vld [vmem:[%s3377_s0 + $0x38] sm:$0xff]  ;;  %v3002_v55 = vpack.c.bf16 %v445_v50, %v441_v45  ;;  %v444_v58 = vld [vmem:[#allocation3 + $0x1b0] sm:$0xff] }
  0x2c   :  { %284 = vmatprep.mubr.f32.mxu1 %v2784_v0  ;;  %2074 = vmatpush1.bf16.msra.mxu1 %v2930_v57  ;;  %v3006_v59 = vpack.c.bf16 %v444_v58, %v440_v56  ;;  %v447_v60 = vld [vmem:[#allocation3 + $0x1c8] sm:$0xff]  ;;  %v449_v63 = vld [vmem:[#allocation3 + $0x1d8] sm:$0xff]  ;;  %v450_v5 = vld [vmem:[#allocation3 + $0x1e0] sm:$0xff]  ;;  %v357_v56 = vlaneseq }
  0x2d   :  { %2046 = vmatpush1.bf16.msra.mxu0 %v2943_v3  ;;  %2076 = vmatprep.subr.bf16.mxu1 %v2945_v4  ;;  %v451_v62 = vld [vmem:[#allocation3 + $0x1e8] sm:$0xff]  ;;  %v453_v6 = vld [vmem:[#allocation3 + $0x1f8] sm:$0xff]  ;;  %v448_v10 = vld [vmem:[#allocation3 + $0x1d0] sm:$0xff] }
  0x2e   :  { %1927 = vmatmul.mubr.msk.f32.gmra.mrb[8].mxu0 %vm55_vm0, %v38_v2  ;;  %2048 = vmatprep.subr.bf16.mxu0 %v2955_v11  ;;  %v3012_v1 = vpack.c.bf16 %v451_v62, %v447_v60  ;;  %v3018_v9 = vpack.c.bf16 %v453_v6, %v449_v63  ;;  %v452_v12 = vld [vmem:[#allocation3 + $0x1f0] sm:$0xff]  ;;  %v3039_v60 = vand.u32 127, %v357_v56 }
  0x2f   :  { %1935 = vmatmul.mubr.msk.f32.gmra.mrb[8].mxu1 %vm55_vm0, %v37_v52  ;;  %177 = vmatprep.mubr.f32.mxu0 %v2784_v0  ;;  %v3000_v52 = vpack.c.bf16 %v442_v49, %v438_v47  ;;  %v3023_v13 = vpack.c.bf16 %v452_v12, %v448_v10 }
  0x30   :  { %290 = vmatprep.mubr.f32.mxu1 %v2784_v0  ;;  %2078 = vmatpush1.bf16.msra.mxu1 %v2949_v7  ;;  %vm359_vm1 = vcmp.lt.s32.totalorder %v3039_v60, 64 }
  0x31   :  { %2050 = vmatpush1.bf16.msra.mxu0 %v2962_v17  ;;  %2080 = vmatprep.subr.bf16.mxu1 %v2964_v18 }
  0x32   :  { %1928 = vmatmul.mubr.msk.f32.gmra.mrb[10].mxu0 %vm55_vm0, %v39_v16  ;;  %2052 = vmatprep.subr.bf16.mxu0 %v2974_v26 }
  0x33   :  { %1936 = vmatmul.mubr.msk.f32.gmra.mrb[10].mxu1 %vm55_vm0, %v38_v2  ;;  %183 = vmatprep.mubr.f32.mxu0 %v2784_v0  ;;  %v446_v2 = vld [vmem:[#allocation3 + $0x1c0] sm:$0xff] }
  0x34   :  { %296 = vmatprep.mubr.f32.mxu1 %v2784_v0  ;;  %2082 = vmatpush1.bf16.msra.mxu1 %v2968_v21  ;;  %v3016_v8 = vpack.c.bf16 %v450_v5, %v446_v2 }
  0x35   :  { %2054 = vmatpush1.bf16.msra.mxu0 %v2981_v34  ;;  %2084 = vmatprep.subr.bf16.mxu1 %v2983_v36 }
  0x36   :  { %1929 = vmatmul.mubr.msk.f32.gmra.mrb[12].mxu0 %vm55_vm0, %v40_v33  ;;  %2056 = vmatprep.subr.bf16.mxu0 %v2993_v46 }
  0x37   :  { %1937 = vmatmul.mubr.msk.f32.gmra.mrb[12].mxu1 %vm55_vm0, %v39_v16  ;;  %189 = vmatprep.mubr.f32.mxu0 %v2784_v0 }
  0x38   :  { %302 = vmatprep.mubr.f32.mxu1 %v2784_v0  ;;  %2086 = vmatpush1.bf16.msra.mxu1 %v2987_v39 }
  0x39   :  { %2058 = vmatpush1.bf16.msra.mxu0 %v3000_v52  ;;  %2088 = vmatprep.subr.bf16.mxu1 %v3002_v55 }
  0x3a   :  { %1930 = vmatmul.mubr.msk.f32.gmra.mrb[14].mxu0 %vm55_vm0, %v41_v51  ;;  %2060 = vmatprep.subr.bf16.mxu0 %v3012_v1 }
  0x3b   :  { %1938 = vmatmul.mubr.msk.f32.gmra.mrb[14].mxu1 %vm55_vm0, %v40_v33  ;;  %522 = vmatprep.mubr.f32.mxu0 %v2784_v0 }
  0x3c   :  { %308 = vmatprep.mubr.f32.mxu1 %v2784_v0  ;;  %2090 = vmatpush1.bf16.msra.mxu1 %v3006_v59 }
  0x3d   :  { %2062 = vmatpush1.bf16.msra.mxu0 %v3016_v8  ;;  %2092 = vmatprep.subr.bf16.mxu1 %v3018_v9 }
  0x3e   :  { %2096 = vmatprep.subr.bf16.mxu0 %v2882_v22 }
  0x3f   :  { %1939 = vmatmul.mubr.msk.f32.gmra.mrb[16].mxu1 %vm55_vm0, %v41_v51 }
  0x40   :  { %314 = vmatprep.mubr.f32.mxu1 %v2784_v0  ;;  %2094 = vmatpush1.bf16.msra.mxu1 %v3023_v13 }
  0x41   :  { %2128 = vmatprep.subr.bf16.mxu1 %v2889_v28 }
  0x43   :  { %1940 = vmatmul.mubr.msk.f32.gmra.mrb[18].mxu1 %vm55_vm0, %v2867_v14 }
  0x44   :  { %593 = vmatprep.mubr.f32.mxu1 %v2784_v0 }
  0xef   :  { %v149_v15 = vpop.f32.mrb[0].mxu0  ;;  %v3032_v16 = vpop.f32.mrb[0].mxu1 }
  0xf0   :  { %v1941_v14 = vmul.f32 -1.442695, %v149_v15  ;;  %v151_v19 = vpop.f32.mrb[1].mxu0  ;;  %v3034_v20 = vpop.f32.mrb[1].mxu1 }
  0xf1   :  { %v1942_v23 = vmul.f32 -1.442695, %v151_v19 }
  0xf2   :  { %2609 = vpow2.f32 %v1941_v14 }
  0xf3   :  { %2611 = vpow2.f32 %v1942_v23 }
  0xf6   :  { %v268_v24 = vpop.f32.mrb[2].mxu1 }
  0xf7   :  { %v270_v25 = vpop.f32.mrb[3].mxu1 }
  0xf8   :  { %v1943_v29 = vmul.f32 -1.442695, %v270_v25 }
  0xfa   :  { %2613 = vpow2.f32 %v1943_v29 }
  0xfb   :  { %2615 = vtanh.f32 %v268_v24 }
  0xfc   :  { %v2610_v30 = vpop.eup %2609 }
  0xfd   :  { %v2612_v32 = vpop.eup %2611  ;;  %v370_v33 = vadd.f32 1.0, %v2610_v30 }
  0xfe   :  { %v371_v37 = vadd.f32 1.0, %v2612_v32 }
  0xff   :  { %2617 = vrcp.f32 %v370_v33 }
 0x100   :  { %2619 = vrcp.f32 %v371_v37 }
 0x104   :  { %v2614_v38 = vpop.eup %2613 }
 0x105   :  { %v2616_v42 = vpop.eup %2615  ;;  %v379_v45 = vadd.f32 1.0, %v2614_v38 }
 0x107   :  { %2621 = vrcp.f32 %v379_v45 }
 0x109   :  { %v2618_v43 = vpop.eup %2617 }
 0x10a   :  { %v2620_v47 = vpop.eup %2619  ;;  %v384_v49 = vmul.f32 %v2618_v43, %v2616_v42 }
 0x10b   :  { %v383_v50 = vmul.f32 0.0, %v2620_v47 }
 0x10d   :  { %v3036_v51 = vadd.f32 %v384_v49, %v383_v50 }
 0x10f   :  { %2623 = vtanh.f32 %v3036_v51  ;;  %v389_v37 = vsel %vm359_vm1, %v3036_v51, 0.0 }
 0x111   :  { %v2622_v58 = vpop.eup %2621 }
 0x119   :  { %v2624_v62 = vpop.eup %2623 }
 0x11a   :  { %v387_v63 = vmul.f32 %v2624_v62, %v2622_v58 }
 0x11c   :  { %1944 = vmatmul.mubr.msk.f32.vlgmr.msra.gmra.mrb[2].mxu0 %vm359_vm1, %v387_v63  ;;  %1945 = vmatmul.mubr.msk.f32.vlgmr.msra.gmra.mrb[4].mxu1 %vm359_vm1, %v387_v63 }
 0x11d   :  { %2098 = vmatpush1.bf16.msra.mxu0 %v2887_v27  ;;  %2130 = vmatpush1.bf16.msra.mxu1 %v2893_v31 }
 0x11e   :  { %2100 = vmatprep.subr.bf16.mxu0 %v2899_v35  ;;  %2132 = vmatprep.subr.bf16.mxu1 %v2907_v41 }
 0x11f   :  { %692 = vmatprep.mubr.f32.mxu0 %v2784_v0  ;;  %763 = vmatprep.mubr.f32.mxu1 %v2784_v0 }
 0x121   :  { %2102 = vmatpush1.bf16.msra.mxu0 %v2905_v40  ;;  %2134 = vmatpush1.bf16.msra.mxu1 %v2911_v44 }
 0x122   :  { %2104 = vmatprep.subr.bf16.mxu0 %v2917_v48  ;;  %2136 = vmatprep.subr.bf16.mxu1 %v2926_v54 }
 0x125   :  { %2106 = vmatpush1.bf16.msra.mxu0 %v2924_v53  ;;  %2138 = vmatpush1.bf16.msra.mxu1 %v2930_v57 }
 0x126   :  { %2108 = vmatprep.subr.bf16.mxu0 %v2936_v61  ;;  %2140 = vmatprep.subr.bf16.mxu1 %v2945_v4 }
 0x129   :  { %2110 = vmatpush1.bf16.msra.mxu0 %v2943_v3  ;;  %2142 = vmatpush1.bf16.msra.mxu1 %v2949_v7 }
 0x12a   :  { %2112 = vmatprep.subr.bf16.mxu0 %v2955_v11  ;;  %2144 = vmatprep.subr.bf16.mxu1 %v2964_v18 }
 0x12d   :  { %2114 = vmatpush1.bf16.msra.mxu0 %v2962_v17  ;;  %2146 = vmatpush1.bf16.msra.mxu1 %v2968_v21 }
 0x12e   :  { %2116 = vmatprep.subr.bf16.mxu0 %v2974_v26  ;;  %2148 = vmatprep.subr.bf16.mxu1 %v2983_v36 }
 0x131   :  { %2118 = vmatpush1.bf16.msra.mxu0 %v2981_v34  ;;  %2150 = vmatpush1.bf16.msra.mxu1 %v2987_v39 }
 0x132   :  { %2120 = vmatprep.subr.bf16.mxu0 %v2993_v46  ;;  %2152 = vmatprep.subr.bf16.mxu1 %v3002_v55 }
 0x135   :  { %2122 = vmatpush1.bf16.msra.mxu0 %v3000_v52  ;;  %2154 = vmatpush1.bf16.msra.mxu1 %v3006_v59 }
 0x136   :  { %2124 = vmatprep.subr.bf16.mxu0 %v3012_v1  ;;  %2156 = vmatprep.subr.bf16.mxu1 %v3018_v9 }
 0x139   :  { %2126 = vmatpush1.bf16.msra.mxu0 %v3016_v8  ;;  %2158 = vmatpush1.bf16.msra.mxu1 %v3023_v13 }
 0x13a   :  { %2160 = vmatprep.subr.bf16.mxu0 %v2882_v22  ;;  %2192 = vmatprep.subr.bf16.mxu1 %v2889_v28 }
 0x1ef   :  { %v524_v2 = vpop.f32.mrb[2].mxu0  ;;  %v595_v5 = vpop.f32.mrb[4].mxu1 }
 0x1f0   :  { %v1946_v6 = vmul.f32 -1.442695, %v524_v2  ;;  %v526_v10 = vpop.f32.mrb[3].mxu0  ;;  %v597_v12 = vpop.f32.mrb[5].mxu1 }
 0x1f1   :  { %v1947_v15 = vmul.f32 -1.442695, %v526_v10  ;;  %v1948_v14 = vmul.f32 -1.442695, %v597_v12 }
 0x1f2   :  { %2625 = vpow2.f32 %v1946_v6 }
 0x1f3   :  { %2627 = vpow2.f32 %v1947_v15 }
 0x1f4   :  { %2629 = vpow2.f32 %v1948_v14 }
 0x1f5   :  { %2631 = vtanh.f32 %v595_v5 }
 0x1fc   :  { %v2626_v19 = vpop.eup %2625 }
 0x1fd   :  { %v2628_v23 = vpop.eup %2627  ;;  %v606_v24 = vadd.f32 1.0, %v2626_v19 }
 0x1fe   :  { %v607_v25 = vadd.f32 1.0, %v2628_v23  ;;  %v2630_v29 = vpop.eup %2629 }
 0x1ff   :  { %2633 = vrcp.f32 %v606_v24  ;;  %v2632_v30 = vpop.eup %2631  ;;  %v615_v42 = vadd.f32 1.0, %v2630_v29 }
 0x200   :  { %2635 = vrcp.f32 %v607_v25 }
 0x201   :  { %2637 = vrcp.f32 %v615_v42 }
 0x209   :  { %v2634_v32 = vpop.eup %2633 }
 0x20a   :  { %v2636_v33 = vpop.eup %2635  ;;  %v620_v38 = vmul.f32 %v2634_v32, %v2632_v30 }
 0x20b   :  { %v619_v43 = vmul.f32 %v2636_v33, %v389_v37  ;;  %v2638_v47 = vpop.eup %2637 }
 0x20d   :  { %v3083_v45 = vadd.f32 %v620_v38, %v619_v43 }
 0x20f   :  { %2639 = vtanh.f32 %v3083_v45 }
 0x219   :  { %v2640_v49 = vpop.eup %2639 }
 0x21a   :  { %v623_v50 = vmul.f32 %v2640_v49, %v2638_v47 }
 0x21c   :  { %693 = vmatmul.mubr.f32.vlgmr.msra.gmra.mrb[4].mxu0 %v623_v50  ;;  %764 = vmatmul.mubr.f32.vlgmr.msra.gmra.mrb[6].mxu1 %v623_v50 }
 0x21d   :  { %2162 = vmatpush1.bf16.msra.mxu0 %v2887_v27  ;;  %2194 = vmatpush1.bf16.msra.mxu1 %v2893_v31 }
 0x21e   :  { %2164 = vmatprep.subr.bf16.mxu0 %v2899_v35  ;;  %2196 = vmatprep.subr.bf16.mxu1 %v2907_v41 }
 0x21f   :  { %862 = vmatprep.mubr.f32.mxu0 %v2784_v0  ;;  %933 = vmatprep.mubr.f32.mxu1 %v2784_v0 }
 0x221   :  { %2166 = vmatpush1.bf16.msra.mxu0 %v2905_v40  ;;  %2198 = vmatpush1.bf16.msra.mxu1 %v2911_v44 }
 0x222   :  { %2168 = vmatprep.subr.bf16.mxu0 %v2917_v48  ;;  %2200 = vmatprep.subr.bf16.mxu1 %v2926_v54 }
 0x225   :  { %2170 = vmatpush1.bf16.msra.mxu0 %v2924_v53  ;;  %2202 = vmatpush1.bf16.msra.mxu1 %v2930_v57 }
 0x226   :  { %2172 = vmatprep.subr.bf16.mxu0 %v2936_v61  ;;  %2204 = vmatprep.subr.bf16.mxu1 %v2945_v4 }
 0x229   :  { %2174 = vmatpush1.bf16.msra.mxu0 %v2943_v3  ;;  %2206 = vmatpush1.bf16.msra.mxu1 %v2949_v7 }
 0x22a   :  { %2176 = vmatprep.subr.bf16.mxu0 %v2955_v11  ;;  %2208 = vmatprep.subr.bf16.mxu1 %v2964_v18 }
 0x22d   :  { %2178 = vmatpush1.bf16.msra.mxu0 %v2962_v17  ;;  %2210 = vmatpush1.bf16.msra.mxu1 %v2968_v21 }
 0x22e   :  { %2180 = vmatprep.subr.bf16.mxu0 %v2974_v26  ;;  %2212 = vmatprep.subr.bf16.mxu1 %v2983_v36 }
 0x231   :  { %2182 = vmatpush1.bf16.msra.mxu0 %v2981_v34  ;;  %2214 = vmatpush1.bf16.msra.mxu1 %v2987_v39 }
 0x232   :  { %2184 = vmatprep.subr.bf16.mxu0 %v2993_v46  ;;  %2216 = vmatprep.subr.bf16.mxu1 %v3002_v55 }
 0x235   :  { %2186 = vmatpush1.bf16.msra.mxu0 %v3000_v52  ;;  %2218 = vmatpush1.bf16.msra.mxu1 %v3006_v59 }
 0x236   :  { %2188 = vmatprep.subr.bf16.mxu0 %v3012_v1  ;;  %2220 = vmatprep.subr.bf16.mxu1 %v3018_v9 }
 0x239   :  { %2190 = vmatpush1.bf16.msra.mxu0 %v3016_v8  ;;  %2222 = vmatpush1.bf16.msra.mxu1 %v3023_v13 }
 0x23a   :  { %2224 = vmatprep.subr.bf16.mxu0 %v2882_v22  ;;  %2256 = vmatprep.subr.bf16.mxu1 %v2889_v28 }
 0x2ef   :  { %v694_v51 = vpop.f32.mrb[4].mxu0  ;;  %v765_v56 = vpop.f32.mrb[6].mxu1 }
 0x2f0   :  { %v1949_v58 = vmul.f32 -1.442695, %v694_v51  ;;  %v696_v62 = vpop.f32.mrb[5].mxu0  ;;  %v767_v63 = vpop.f32.mrb[7].mxu1 }
 0x2f1   :  { %v1950_v2 = vmul.f32 -1.442695, %v696_v62  ;;  %v1951_v5 = vmul.f32 -1.442695, %v767_v63 }
 0x2f2   :  { %2641 = vpow2.f32 %v1949_v58 }
 0x2f3   :  { %2643 = vpow2.f32 %v1950_v2 }
 0x2f4   :  { %2645 = vpow2.f32 %v1951_v5 }
 0x2f5   :  { %2647 = vtanh.f32 %v765_v56 }
 0x2fc   :  { %v2642_v6 = vpop.eup %2641 }
 0x2fd   :  { %v2644_v10 = vpop.eup %2643  ;;  %v776_v12 = vadd.f32 1.0, %v2642_v6 }
 0x2fe   :  { %v777_v15 = vadd.f32 1.0, %v2644_v10  ;;  %v2646_v14 = vpop.eup %2645 }
 0x2ff   :  { %2649 = vrcp.f32 %v776_v12  ;;  %v2648_v19 = vpop.eup %2647  ;;  %v785_v29 = vadd.f32 1.0, %v2646_v14 }
 0x300   :  { %2651 = vrcp.f32 %v777_v15 }
 0x301   :  { %2653 = vrcp.f32 %v785_v29 }
 0x309   :  { %v2650_v23 = vpop.eup %2649 }
 0x30a   :  { %v2652_v24 = vpop.eup %2651  ;;  %v790_v25 = vmul.f32 %v2650_v23, %v2648_v19 }
 0x30b   :  { %v789_v30 = vmul.f32 %v2652_v24, %v3083_v45  ;;  %v2654_v33 = vpop.eup %2653 }
 0x30d   :  { %v3121_v32 = vadd.f32 %v790_v25, %v789_v30 }
 0x30f   :  { %2655 = vtanh.f32 %v3121_v32 }
 0x319   :  { %v2656_v37 = vpop.eup %2655 }
 0x31a   :  { %v793_v38 = vmul.f32 %v2656_v37, %v2654_v33 }
 0x31c   :  { %863 = vmatmul.mubr.f32.vlgmr.msra.gmra.mrb[6].mxu0 %v793_v38  ;;  %934 = vmatmul.mubr.f32.vlgmr.msra.gmra.mrb[8].mxu1 %v793_v38 }
 0x31d   :  { %2226 = vmatpush1.bf16.msra.mxu0 %v2887_v27  ;;  %2258 = vmatpush1.bf16.msra.mxu1 %v2893_v31 }
 0x31e   :  { %2228 = vmatprep.subr.bf16.mxu0 %v2899_v35  ;;  %2260 = vmatprep.subr.bf16.mxu1 %v2907_v41 }
 0x31f   :  { %1032 = vmatprep.mubr.f32.mxu0 %v2784_v0  ;;  %1103 = vmatprep.mubr.f32.mxu1 %v2784_v0 }
 0x321   :  { %2230 = vmatpush1.bf16.msra.mxu0 %v2905_v40  ;;  %2262 = vmatpush1.bf16.msra.mxu1 %v2911_v44 }
 0x322   :  { %2232 = vmatprep.subr.bf16.mxu0 %v2917_v48  ;;  %2264 = vmatprep.subr.bf16.mxu1 %v2926_v54 }
 0x325   :  { %2234 = vmatpush1.bf16.msra.mxu0 %v2924_v53  ;;  %2266 = vmatpush1.bf16.msra.mxu1 %v2930_v57 }
 0x326   :  { %2236 = vmatprep.subr.bf16.mxu0 %v2936_v61  ;;  %2268 = vmatprep.subr.bf16.mxu1 %v2945_v4 }
 0x329   :  { %2238 = vmatpush1.bf16.msra.mxu0 %v2943_v3  ;;  %2270 = vmatpush1.bf16.msra.mxu1 %v2949_v7 }
 0x32a   :  { %2240 = vmatprep.subr.bf16.mxu0 %v2955_v11  ;;  %2272 = vmatprep.subr.bf16.mxu1 %v2964_v18 }
 0x32d   :  { %2242 = vmatpush1.bf16.msra.mxu0 %v2962_v17  ;;  %2274 = vmatpush1.bf16.msra.mxu1 %v2968_v21 }
 0x32e   :  { %2244 = vmatprep.subr.bf16.mxu0 %v2974_v26  ;;  %2276 = vmatprep.subr.bf16.mxu1 %v2983_v36 }
 0x331   :  { %2246 = vmatpush1.bf16.msra.mxu0 %v2981_v34  ;;  %2278 = vmatpush1.bf16.msra.mxu1 %v2987_v39 }
 0x332   :  { %2248 = vmatprep.subr.bf16.mxu0 %v2993_v46  ;;  %2280 = vmatprep.subr.bf16.mxu1 %v3002_v55 }
 0x335   :  { %2250 = vmatpush1.bf16.msra.mxu0 %v3000_v52  ;;  %2282 = vmatpush1.bf16.msra.mxu1 %v3006_v59 }
 0x336   :  { %2252 = vmatprep.subr.bf16.mxu0 %v3012_v1  ;;  %2284 = vmatprep.subr.bf16.mxu1 %v3018_v9 }
 0x339   :  { %2254 = vmatpush1.bf16.msra.mxu0 %v3016_v8  ;;  %2286 = vmatpush1.bf16.msra.mxu1 %v3023_v13 }
 0x33a   :  { %2288 = vmatprep.subr.bf16.mxu0 %v2882_v22  ;;  %2320 = vmatprep.subr.bf16.mxu1 %v2889_v28 }
 0x3ef   :  { %v864_v42 = vpop.f32.mrb[6].mxu0  ;;  %v935_v43 = vpop.f32.mrb[8].mxu1 }
 0x3f0   :  { %v1952_v45 = vmul.f32 -1.442695, %v864_v42  ;;  %v866_v47 = vpop.f32.mrb[7].mxu0  ;;  %v937_v49 = vpop.f32.mrb[9].mxu1 }
 0x3f1   :  { %v1953_v50 = vmul.f32 -1.442695, %v866_v47  ;;  %v1954_v51 = vmul.f32 -1.442695, %v937_v49 }
 0x3f2   :  { %2657 = vpow2.f32 %v1952_v45 }
 0x3f3   :  { %2659 = vpow2.f32 %v1953_v50 }
 0x3f4   :  { %2661 = vpow2.f32 %v1954_v51 }
 0x3f5   :  { %2663 = vtanh.f32 %v935_v43 }
 0x3fc   :  { %v2658_v56 = vpop.eup %2657 }
 0x3fd   :  { %v2660_v58 = vpop.eup %2659  ;;  %v946_v62 = vadd.f32 1.0, %v2658_v56 }
 0x3fe   :  { %v947_v63 = vadd.f32 1.0, %v2660_v58  ;;  %v2662_v2 = vpop.eup %2661 }
 0x3ff   :  { %2665 = vrcp.f32 %v946_v62  ;;  %v2664_v5 = vpop.eup %2663  ;;  %v955_v15 = vadd.f32 1.0, %v2662_v2 }
 0x400   :  { %2667 = vrcp.f32 %v947_v63 }
 0x401   :  { %2669 = vrcp.f32 %v955_v15 }
 0x409   :  { %v2666_v6 = vpop.eup %2665 }
 0x40a   :  { %v2668_v10 = vpop.eup %2667  ;;  %v960_v12 = vmul.f32 %v2666_v6, %v2664_v5 }
 0x40b   :  { %v959_v14 = vmul.f32 %v2668_v10, %v3121_v32  ;;  %v2670_v23 = vpop.eup %2669 }
 0x40d   :  { %v3159_v19 = vadd.f32 %v960_v12, %v959_v14 }
 0x40f   :  { %2671 = vtanh.f32 %v3159_v19 }
 0x419   :  { %v2672_v24 = vpop.eup %2671 }
 0x41a   :  { %v963_v25 = vmul.f32 %v2672_v24, %v2670_v23 }
 0x41c   :  { %1033 = vmatmul.mubr.f32.vlgmr.msra.gmra.mrb[8].mxu0 %v963_v25  ;;  %1104 = vmatmul.mubr.f32.vlgmr.msra.gmra.mrb[10].mxu1 %v963_v25 }
 0x41d   :  { %2290 = vmatpush1.bf16.msra.mxu0 %v2887_v27  ;;  %2322 = vmatpush1.bf16.msra.mxu1 %v2893_v31 }
 0x41e   :  { %2292 = vmatprep.subr.bf16.mxu0 %v2899_v35  ;;  %2324 = vmatprep.subr.bf16.mxu1 %v2907_v41 }
 0x41f   :  { %1202 = vmatprep.mubr.f32.mxu0 %v2784_v0  ;;  %1273 = vmatprep.mubr.f32.mxu1 %v2784_v0 }
 0x421   :  { %2294 = vmatpush1.bf16.msra.mxu0 %v2905_v40  ;;  %2326 = vmatpush1.bf16.msra.mxu1 %v2911_v44 }
 0x422   :  { %2296 = vmatprep.subr.bf16.mxu0 %v2917_v48  ;;  %2328 = vmatprep.subr.bf16.mxu1 %v2926_v54 }
 0x425   :  { %2298 = vmatpush1.bf16.msra.mxu0 %v2924_v53  ;;  %2330 = vmatpush1.bf16.msra.mxu1 %v2930_v57 }
 0x426   :  { %2300 = vmatprep.subr.bf16.mxu0 %v2936_v61  ;;  %2332 = vmatprep.subr.bf16.mxu1 %v2945_v4 }
 0x429   :  { %2302 = vmatpush1.bf16.msra.mxu0 %v2943_v3  ;;  %2334 = vmatpush1.bf16.msra.mxu1 %v2949_v7 }
 0x42a   :  { %2304 = vmatprep.subr.bf16.mxu0 %v2955_v11  ;;  %2336 = vmatprep.subr.bf16.mxu1 %v2964_v18 }
 0x42d   :  { %2306 = vmatpush1.bf16.msra.mxu0 %v2962_v17  ;;  %2338 = vmatpush1.bf16.msra.mxu1 %v2968_v21 }
 0x42e   :  { %2308 = vmatprep.subr.bf16.mxu0 %v2974_v26  ;;  %2340 = vmatprep.subr.bf16.mxu1 %v2983_v36 }
 0x431   :  { %2310 = vmatpush1.bf16.msra.mxu0 %v2981_v34  ;;  %2342 = vmatpush1.bf16.msra.mxu1 %v2987_v39 }
 0x432   :  { %2312 = vmatprep.subr.bf16.mxu0 %v2993_v46  ;;  %2344 = vmatprep.subr.bf16.mxu1 %v3002_v55 }
 0x435   :  { %2314 = vmatpush1.bf16.msra.mxu0 %v3000_v52  ;;  %2346 = vmatpush1.bf16.msra.mxu1 %v3006_v59 }
 0x436   :  { %2316 = vmatprep.subr.bf16.mxu0 %v3012_v1  ;;  %2348 = vmatprep.subr.bf16.mxu1 %v3018_v9 }
 0x439   :  { %2318 = vmatpush1.bf16.msra.mxu0 %v3016_v8  ;;  %2350 = vmatpush1.bf16.msra.mxu1 %v3023_v13 }
 0x43a   :  { %2352 = vmatprep.subr.bf16.mxu0 %v2882_v22  ;;  %2384 = vmatprep.subr.bf16.mxu1 %v2889_v28 }
 0x4ef   :  { %v1034_v29 = vpop.f32.mrb[8].mxu0  ;;  %v1105_v30 = vpop.f32.mrb[10].mxu1 }
 0x4f0   :  { %v1955_v32 = vmul.f32 -1.442695, %v1034_v29  ;;  %v1036_v33 = vpop.f32.mrb[9].mxu0  ;;  %v1107_v37 = vpop.f32.mrb[11].mxu1 }
 0x4f1   :  { %v1956_v38 = vmul.f32 -1.442695, %v1036_v33  ;;  %v1957_v42 = vmul.f32 -1.442695, %v1107_v37 }
 0x4f2   :  { %2673 = vpow2.f32 %v1955_v32 }
 0x4f3   :  { %2675 = vpow2.f32 %v1956_v38 }
 0x4f4   :  { %2677 = vpow2.f32 %v1957_v42 }
 0x4f5   :  { %2679 = vtanh.f32 %v1105_v30 }
 0x4fc   :  { %v2674_v43 = vpop.eup %2673 }
 0x4fd   :  { %v2676_v45 = vpop.eup %2675  ;;  %v1116_v47 = vadd.f32 1.0, %v2674_v43 }
 0x4fe   :  { %v1117_v49 = vadd.f32 1.0, %v2676_v45  ;;  %v2678_v50 = vpop.eup %2677 }
 0x4ff   :  { %2681 = vrcp.f32 %v1116_v47  ;;  %v2680_v51 = vpop.eup %2679  ;;  %v1125_v63 = vadd.f32 1.0, %v2678_v50 }
 0x500   :  { %2683 = vrcp.f32 %v1117_v49 }
 0x501   :  { %2685 = vrcp.f32 %v1125_v63 }
 0x509   :  { %v2682_v56 = vpop.eup %2681 }
 0x50a   :  { %v2684_v58 = vpop.eup %2683  ;;  %v1130_v62 = vmul.f32 %v2682_v56, %v2680_v51 }
 0x50b   :  { %v1129_v2 = vmul.f32 %v2684_v58, %v3159_v19  ;;  %v2686_v6 = vpop.eup %2685 }
 0x50d   :  { %v3197_v5 = vadd.f32 %v1130_v62, %v1129_v2 }
 0x50f   :  { %2687 = vtanh.f32 %v3197_v5 }
 0x519   :  { %v2688_v10 = vpop.eup %2687 }
 0x51a   :  { %v1133_v12 = vmul.f32 %v2688_v10, %v2686_v6 }
 0x51c   :  { %1203 = vmatmul.mubr.f32.vlgmr.msra.gmra.mrb[10].mxu0 %v1133_v12  ;;  %1274 = vmatmul.mubr.f32.vlgmr.msra.gmra.mrb[12].mxu1 %v1133_v12 }
 0x51d   :  { %2354 = vmatpush1.bf16.msra.mxu0 %v2887_v27  ;;  %2386 = vmatpush1.bf16.msra.mxu1 %v2893_v31 }
 0x51e   :  { %2356 = vmatprep.subr.bf16.mxu0 %v2899_v35  ;;  %2388 = vmatprep.subr.bf16.mxu1 %v2907_v41 }
 0x51f   :  { %1372 = vmatprep.mubr.f32.mxu0 %v2784_v0  ;;  %1443 = vmatprep.mubr.f32.mxu1 %v2784_v0 }
 0x521   :  { %2358 = vmatpush1.bf16.msra.mxu0 %v2905_v40  ;;  %2390 = vmatpush1.bf16.msra.mxu1 %v2911_v44 }
 0x522   :  { %2360 = vmatprep.subr.bf16.mxu0 %v2917_v48  ;;  %2392 = vmatprep.subr.bf16.mxu1 %v2926_v54 }
 0x525   :  { %2362 = vmatpush1.bf16.msra.mxu0 %v2924_v53  ;;  %2394 = vmatpush1.bf16.msra.mxu1 %v2930_v57 }
 0x526   :  { %2364 = vmatprep.subr.bf16.mxu0 %v2936_v61  ;;  %2396 = vmatprep.subr.bf16.mxu1 %v2945_v4 }
 0x529   :  { %2366 = vmatpush1.bf16.msra.mxu0 %v2943_v3  ;;  %2398 = vmatpush1.bf16.msra.mxu1 %v2949_v7 }
 0x52a   :  { %2368 = vmatprep.subr.bf16.mxu0 %v2955_v11  ;;  %2400 = vmatprep.subr.bf16.mxu1 %v2964_v18 }
 0x52d   :  { %2370 = vmatpush1.bf16.msra.mxu0 %v2962_v17  ;;  %2402 = vmatpush1.bf16.msra.mxu1 %v2968_v21 }
 0x52e   :  { %2372 = vmatprep.subr.bf16.mxu0 %v2974_v26  ;;  %2404 = vmatprep.subr.bf16.mxu1 %v2983_v36 }
 0x531   :  { %2374 = vmatpush1.bf16.msra.mxu0 %v2981_v34  ;;  %2406 = vmatpush1.bf16.msra.mxu1 %v2987_v39 }
 0x532   :  { %2376 = vmatprep.subr.bf16.mxu0 %v2993_v46  ;;  %2408 = vmatprep.subr.bf16.mxu1 %v3002_v55 }
 0x535   :  { %2378 = vmatpush1.bf16.msra.mxu0 %v3000_v52  ;;  %2410 = vmatpush1.bf16.msra.mxu1 %v3006_v59 }
 0x536   :  { %2380 = vmatprep.subr.bf16.mxu0 %v3012_v1  ;;  %2412 = vmatprep.subr.bf16.mxu1 %v3018_v9 }
 0x539   :  { %2382 = vmatpush1.bf16.msra.mxu0 %v3016_v8  ;;  %2414 = vmatpush1.bf16.msra.mxu1 %v3023_v13 }
 0x53a   :  { %2416 = vmatprep.subr.bf16.mxu0 %v2882_v22  ;;  %2448 = vmatprep.subr.bf16.mxu1 %v2889_v28 }
 0x5ef   :  { %v1204_v15 = vpop.f32.mrb[10].mxu0  ;;  %v1275_v14 = vpop.f32.mrb[12].mxu1 }
 0x5f0   :  { %v1958_v19 = vmul.f32 -1.442695, %v1204_v15  ;;  %v1206_v23 = vpop.f32.mrb[11].mxu0  ;;  %v1277_v24 = vpop.f32.mrb[13].mxu1 }
 0x5f1   :  { %v1959_v25 = vmul.f32 -1.442695, %v1206_v23  ;;  %v1960_v29 = vmul.f32 -1.442695, %v1277_v24 }
 0x5f2   :  { %2689 = vpow2.f32 %v1958_v19 }
 0x5f3   :  { %2691 = vpow2.f32 %v1959_v25 }
 0x5f4   :  { %2693 = vpow2.f32 %v1960_v29 }
 0x5f5   :  { %2695 = vtanh.f32 %v1275_v14 }
 0x5fc   :  { %v2690_v30 = vpop.eup %2689 }
 0x5fd   :  { %v2692_v32 = vpop.eup %2691  ;;  %v1286_v33 = vadd.f32 1.0, %v2690_v30 }
 0x5fe   :  { %v1287_v37 = vadd.f32 1.0, %v2692_v32  ;;  %v2694_v38 = vpop.eup %2693 }
 0x5ff   :  { %2697 = vrcp.f32 %v1286_v33  ;;  %v2696_v42 = vpop.eup %2695  ;;  %v1295_v49 = vadd.f32 1.0, %v2694_v38 }
 0x600   :  { %2699 = vrcp.f32 %v1287_v37 }
 0x601   :  { %2701 = vrcp.f32 %v1295_v49  ;;  %v1821_v49 = vld [vmem:[%s3380_s3 + $0x30] sm:$0xff] }
 0x609   :  { %v2698_v43 = vpop.eup %2697 }
 0x60a   :  { %v2700_v45 = vpop.eup %2699  ;;  %v1300_v47 = vmul.f32 %v2698_v43, %v2696_v42 }
 0x60b   :  { %v1299_v50 = vmul.f32 %v2700_v45, %v3197_v5  ;;  %v2702_v56 = vpop.eup %2701  ;;  %v1820_v45 = vld [vmem:[%s3380_s3 + $0x28] sm:$0xff] }
 0x60d   :  { %v3235_v51 = vadd.f32 %v1300_v47, %v1299_v50  ;;  %v1822_v50 = vld [vmem:[%s3380_s3 + $0x38] sm:$0xff] }
 0x60f   :  { %2703 = vtanh.f32 %v3235_v51 }
 0x619   :  { %v2704_v58 = vpop.eup %2703 }
 0x61a   :  { %v1303_v62 = vmul.f32 %v2704_v58, %v2702_v56  ;;  %v1823_v56 = vld [vmem:[%s3380_s3 + $0x40] sm:$0xff]  ;;  %v1824_v58 = vld [vmem:[%s3380_s3 + $0x48] sm:$0xff] }
 0x61c   :  { %1373 = vmatmul.mubr.f32.vlgmr.msra.gmra.mrb[12].mxu0 %v1303_v62  ;;  %1444 = vmatmul.mubr.f32.vlgmr.msra.gmra.mrb[14].mxu1 %v1303_v62  ;;  %v2556_v62 = vpack.c.bf16 %v1824_v58, %v1823_v56 }
 0x61d   :  { %2418 = vmatpush1.bf16.msra.mxu0 %v2887_v27  ;;  %2450 = vmatpush1.bf16.msra.mxu1 %v2893_v31 }
 0x61e   :  { %2420 = vmatprep.subr.bf16.mxu0 %v2899_v35  ;;  %2452 = vmatprep.subr.bf16.mxu1 %v2907_v41 }
 0x61f   :  { %1542 = vmatprep.mubr.f32.mxu0 %v2784_v0  ;;  %1613 = vmatprep.mubr.f32.mxu1 %v2784_v0 }
 0x621   :  { %2422 = vmatpush1.bf16.msra.mxu0 %v2905_v40  ;;  %2454 = vmatpush1.bf16.msra.mxu1 %v2911_v44 }
 0x622   :  { %2424 = vmatprep.subr.bf16.mxu0 %v2917_v48  ;;  %2456 = vmatprep.subr.bf16.mxu1 %v2926_v54 }
 0x625   :  { %2426 = vmatpush1.bf16.msra.mxu0 %v2924_v53  ;;  %2458 = vmatpush1.bf16.msra.mxu1 %v2930_v57 }
 0x626   :  { %2428 = vmatprep.subr.bf16.mxu0 %v2936_v61  ;;  %2460 = vmatprep.subr.bf16.mxu1 %v2945_v4 }
 0x629   :  { %2430 = vmatpush1.bf16.msra.mxu0 %v2943_v3  ;;  %2462 = vmatpush1.bf16.msra.mxu1 %v2949_v7 }
 0x62a   :  { %2432 = vmatprep.subr.bf16.mxu0 %v2955_v11  ;;  %2464 = vmatprep.subr.bf16.mxu1 %v2964_v18 }
 0x62d   :  { %2434 = vmatpush1.bf16.msra.mxu0 %v2962_v17  ;;  %2466 = vmatpush1.bf16.msra.mxu1 %v2968_v21 }
 0x62e   :  { %2436 = vmatprep.subr.bf16.mxu0 %v2974_v26  ;;  %2468 = vmatprep.subr.bf16.mxu1 %v2983_v36 }
 0x631   :  { %2438 = vmatpush1.bf16.msra.mxu0 %v2981_v34  ;;  %2470 = vmatpush1.bf16.msra.mxu1 %v2987_v39 }
 0x632   :  { %2440 = vmatprep.subr.bf16.mxu0 %v2993_v46  ;;  %2472 = vmatprep.subr.bf16.mxu1 %v3002_v55 }
 0x635   :  { %2442 = vmatpush1.bf16.msra.mxu0 %v3000_v52  ;;  %2474 = vmatpush1.bf16.msra.mxu1 %v3006_v59 }
 0x636   :  { %2444 = vmatprep.subr.bf16.mxu0 %v3012_v1  ;;  %2476 = vmatprep.subr.bf16.mxu1 %v3018_v9 }
 0x639   :  { %2446 = vmatpush1.bf16.msra.mxu0 %v3016_v8  ;;  %2478 = vmatpush1.bf16.msra.mxu1 %v3023_v13 }
 0x63a   :  { %2480 = vmatprep.subr.bf16.mxu0 %v2882_v22  ;;  %2512 = vmatprep.subr.bf16.mxu1 %v2889_v28 }
 0x6ef   :  { %v1374_v63 = vpop.f32.mrb[12].mxu0  ;;  %v1445_v2 = vpop.f32.mrb[14].mxu1 }
 0x6f0   :  { %v1961_v5 = vmul.f32 -1.442695, %v1374_v63  ;;  %v1376_v6 = vpop.f32.mrb[13].mxu0  ;;  %v1447_v10 = vpop.f32.mrb[15].mxu1  ;;  %v1825_v63 = vld [vmem:[%s3380_s3 + $0x50] sm:$0xff] }
 0x6f1   :  { %v1962_v12 = vmul.f32 -1.442695, %v1376_v6  ;;  %v1963_v15 = vmul.f32 -1.442695, %v1447_v10  ;;  %v1827_v6 = vld [vmem:[%s3380_s3 + $0x60] sm:$0xff]  ;;  %v1828_v10 = vld [vmem:[%s3380_s3 + $0x68] sm:$0xff] }
 0x6f2   :  { %2705 = vpow2.f32 %v1961_v5 }
 0x6f3   :  { %2707 = vpow2.f32 %v1962_v12  ;;  %v2562_v12 = vpack.c.bf16 %v1828_v10, %v1827_v6 }
 0x6f4   :  { %2709 = vpow2.f32 %v1963_v15  ;;  %v1829_v15 = vld [vmem:[%s3380_s3 + $0x70] sm:$0xff] }
 0x6f5   :  { %2711 = vtanh.f32 %v1445_v2  ;;  %v1826_v2 = vld [vmem:[%s3380_s3 + $0x58] sm:$0xff] }
 0x6f6   :  { %v2559_v5 = vpack.c.bf16 %v1826_v2, %v1825_v63 }
 0x6fc   :  { %v2706_v14 = vpop.eup %2705 }
 0x6fd   :  { %v2708_v19 = vpop.eup %2707  ;;  %v1456_v23 = vadd.f32 1.0, %v2706_v14  ;;  %v1830_v14 = vld [vmem:[%s3380_s3 + $0x78] sm:$0xff] }
 0x6fe   :  { %v1457_v24 = vadd.f32 1.0, %v2708_v19  ;;  %v2710_v22 = vpop.eup %2709  ;;  %v2565_v19 = vpack.c.bf16 %v1830_v14, %v1829_v15 }
 0x6ff   :  { %2713 = vrcp.f32 %v1456_v23  ;;  %v2712_v25 = vpop.eup %2711  ;;  %v1465_v32 = vadd.f32 1.0, %v2710_v22 }
 0x700   :  { %2715 = vrcp.f32 %v1457_v24 }
 0x701   :  { %2717 = vrcp.f32 %v1465_v32 }
 0x709   :  { %v2714_v28 = vpop.eup %2713 }
 0x70a   :  { %v2716_v29 = vpop.eup %2715  ;;  %v1470_v30 = vmul.f32 %v2714_v28, %v2712_v25 }
 0x70b   :  { %v1469_v33 = vmul.f32 %v2716_v29, %v3235_v51  ;;  %v2718_v38 = vpop.eup %2717  ;;  %v2553_v51 = vpack.c.bf16 %v1822_v50, %v1821_v49 }
 0x70d   :  { %v3273_v37 = vadd.f32 %v1470_v30, %v1469_v33 }
 0x70f   :  { %2719 = vtanh.f32 %v3273_v37 }
 0x719   :  { %v2720_v42 = vpop.eup %2719 }
 0x71a   :  { %v1473_v43 = vmul.f32 %v2720_v42, %v2718_v38 }
 0x71c   :  { %1543 = vmatmul.mubr.f32.vlgmr.msra.gmra.mrb[14].mxu0 %v1473_v43  ;;  %1614 = vmatmul.mubr.f32.vlgmr.msra.gmra.mrb[16].mxu1 %v1473_v43 }
 0x71d   :  { %2482 = vmatpush1.bf16.msra.mxu0 %v2887_v27  ;;  %2514 = vmatpush1.bf16.msra.mxu1 %v2893_v31 }
 0x71e   :  { %2484 = vmatprep.subr.bf16.mxu0 %v2899_v35  ;;  %2516 = vmatprep.subr.bf16.mxu1 %v2907_v41 }
 0x71f   :  { %1712 = vmatprep.mubr.f32.mxu0 %v2784_v0  ;;  %1783 = vmatprep.mubr.f32.mxu1 %v2784_v0 }
 0x721   :  { %2486 = vmatpush1.bf16.msra.mxu0 %v2905_v40  ;;  %2518 = vmatpush1.bf16.msra.mxu1 %v2911_v44 }
 0x722   :  { %2488 = vmatprep.subr.bf16.mxu0 %v2917_v48  ;;  %2520 = vmatprep.subr.bf16.mxu1 %v2926_v54 }
 0x725   :  { %2490 = vmatpush1.bf16.msra.mxu0 %v2924_v53  ;;  %2522 = vmatpush1.bf16.msra.mxu1 %v2930_v57 }
 0x726   :  { %2492 = vmatprep.subr.bf16.mxu0 %v2936_v61  ;;  %2524 = vmatprep.subr.bf16.mxu1 %v2945_v4 }
 0x729   :  { %2494 = vmatpush1.bf16.msra.mxu0 %v2943_v3  ;;  %2526 = vmatpush1.bf16.msra.mxu1 %v2949_v7 }
 0x72a   :  { %2496 = vmatprep.subr.bf16.mxu0 %v2955_v11  ;;  %2528 = vmatprep.subr.bf16.mxu1 %v2964_v18 }
 0x72d   :  { %2498 = vmatpush1.bf16.msra.mxu0 %v2962_v17  ;;  %2530 = vmatpush1.bf16.msra.mxu1 %v2968_v21 }
 0x72e   :  { %2500 = vmatprep.subr.bf16.mxu0 %v2974_v26  ;;  %2532 = vmatprep.subr.bf16.mxu1 %v2983_v36 }
 0x731   :  { %2502 = vmatpush1.bf16.msra.mxu0 %v2981_v34  ;;  %2534 = vmatpush1.bf16.msra.mxu1 %v2987_v39 }
 0x732   :  { %2504 = vmatprep.subr.bf16.mxu0 %v2993_v46  ;;  %2536 = vmatprep.subr.bf16.mxu1 %v3002_v55  ;;  %v1815_v46 = vld [vmem:[%s3380_s3] sm:$0xff] }
 0x735   :  { %2506 = vmatpush1.bf16.msra.mxu0 %v3000_v52  ;;  %2538 = vmatpush1.bf16.msra.mxu1 %v3006_v59  ;;  %v1816_v52 = vld [vmem:[%s3380_s3 + $0x8] sm:$0xff]  ;;  %v2785_v59 = vmov 0.0|0.0  }
 0x736   :  { %2508 = vmatprep.subr.bf16.mxu0 %v3012_v1  ;;  %2540 = vmatprep.subr.bf16.mxu1 %v3018_v9  ;;  %v2544_v55 = vpack.c.bf16 %v1816_v52, %v1815_v46  ;;  %v1817_v1 = vld [vmem:[%s3380_s3 + $0x10] sm:$0xff] }
 0x739   :  { %2510 = vmatpush1.bf16.msra.mxu0 %v3016_v8  ;;  %2542 = vmatpush1.bf16.msra.mxu1 %v3023_v13  ;;  %v1818_v8 = vld [vmem:[%s3380_s3 + $0x18] sm:$0xff]  ;;  %v1819_v13 = vld [vmem:[%s3380_s3 + $0x20] sm:$0xff] }
 0x73a   :  { %2543 = vmatprep.subr.bf16.mxu0 %v2785_v59  ;;  %v2547_v9 = vpack.c.bf16 %v1818_v8, %v1817_v1  ;;  %v2550_v47 = vpack.c.bf16 %v1820_v45, %v1819_v13 }
 0x7ef   :  { %v1544_v27 = vpop.f32.mrb[14].mxu0  ;;  %v1615_v31 = vpop.f32.mrb[16].mxu1 }
 0x7f0   :  { %v1964_v35 = vmul.f32 -1.442695, %v1544_v27  ;;  %v1546_v40 = vpop.f32.mrb[15].mxu0  ;;  %v1617_v41 = vpop.f32.mrb[17].mxu1 }
 0x7f1   :  { %v1965_v44 = vmul.f32 -1.442695, %v1546_v40  ;;  %v1966_v48 = vmul.f32 -1.442695, %v1617_v41 }
 0x7f2   :  { %2721 = vpow2.f32 %v1964_v35 }
 0x7f3   :  { %2723 = vpow2.f32 %v1965_v44 }
 0x7f4   :  { %2725 = vpow2.f32 %v1966_v48 }
 0x7f5   :  { %2727 = vtanh.f32 %v1615_v31 }
 0x7fc   :  { %v2722_v53 = vpop.eup %2721 }
 0x7fd   :  { %v2724_v54 = vpop.eup %2723  ;;  %v1626_v57 = vadd.f32 1.0, %v2722_v53 }
 0x7fe   :  { %v1627_v61 = vadd.f32 1.0, %v2724_v54  ;;  %v2726_v3 = vpop.eup %2725 }
 0x7ff   :  { %2729 = vrcp.f32 %v1626_v57  ;;  %v2728_v4 = vpop.eup %2727  ;;  %v1635_v18 = vadd.f32 1.0, %v2726_v3  ;;  %v1970_v57 = vld [vmem:[%s3381_s4] ss:$0 sm:$0xff] }
 0x800   :  { %2731 = vrcp.f32 %v1627_v61 }
 0x801   :  { %2733 = vrcp.f32 %v1635_v18 }
 0x809   :  { %v2730_v7 = vpop.eup %2729 }
 0x80a   :  { %v2732_v11 = vpop.eup %2731  ;;  %v1640_v17 = vmul.f32 %v2730_v7, %v2728_v4 }
 0x80b   :  { %v1639_v21 = vmul.f32 %v2732_v11, %v3273_v37  ;;  %v2734_v34 = vpop.eup %2733 }
 0x80d   :  { %v3309_v26 = vadd.f32 %v1640_v17, %v1639_v21 }
 0x80f   :  { %2735 = vtanh.f32 %v3309_v26 }
 0x819   :  { %v2736_v36 = vpop.eup %2735 }
 0x81a   :  { %v3312_v39 = vmul.f32 %v2736_v36, %v2734_v34 }
 0x81c   :  { %1713 = vmatmul.mubr.f32.vlgmr.msra.gmra.mrb[16].mxu0 %v3312_v39  ;;  %1784 = vmatmul.mubr.f32.vlgmr.msra.gmra.mrb[18].mxu1 %v3312_v39 }
 0x81d   :  { %2545 = vmatpush3.bf16.msra.mxu0 %v2544_v55  ;;  %2020 = vmatprep.mubr.msk.f32.mxu0 %vm2786_vm2, %v2784_v0 }
 0x81e   :  { %2546 = vmatprep.subr.bf16.mxu0 %v2785_v59 }
 0x821   :  { %2548 = vmatpush3.bf16.msra.mxu0 %v2547_v9 }
 0x822   :  { %2549 = vmatprep.subr.bf16.mxu0 %v2785_v59 }
 0x825   :  { %2551 = vmatpush3.bf16.msra.mxu0 %v2550_v47 }
 0x826   :  { %2552 = vmatprep.subr.bf16.mxu0 %v2785_v59 }
 0x829   :  { %2554 = vmatpush3.bf16.msra.mxu0 %v2553_v51 }
 0x82a   :  { %2555 = vmatprep.subr.bf16.mxu0 %v2785_v59 }
 0x82d   :  { %2557 = vmatpush3.bf16.msra.mxu0 %v2556_v62 }
 0x82e   :  { %2558 = vmatprep.subr.bf16.mxu0 %v2785_v59 }
 0x831   :  { %2560 = vmatpush3.bf16.msra.mxu0 %v2559_v5 }
 0x832   :  { %2561 = vmatprep.subr.bf16.mxu0 %v2785_v59 }
 0x835   :  { %2563 = vmatpush3.bf16.msra.mxu0 %v2562_v12 }
 0x836   :  { %2564 = vmatprep.subr.bf16.mxu0 %v2785_v59 }
 0x839   :  { %2566 = vmatpush3.bf16.msra.mxu0 %v2565_v19 }
 0x8ef   :  { %v1714_v23 = vpop.f32.mrb[16].mxu0  ;;  %v1785_v24 = vpop.f32.mrb[18].mxu1 }
 0x8f0   :  { %v1715_v22 = vadd.f32 %v1714_v23, %v3032_v16  ;;  %v1716_v0 = vpop.f32.mrb[17].mxu0  ;;  %v1787_v25 = vpop.f32.mrb[19].mxu1 }
 0x8f1   :  { %v1717_v28 = vadd.f32 %v1716_v0, %v3034_v20  ;;  %v1969_v32 = vmul.f32 -1.442695, %v1787_v25 }
 0x8f2   :  { %v1967_v29 = vmul.f32 -1.442695, %v1715_v22 }
 0x8f3   :  { %v1968_v30 = vmul.f32 -1.442695, %v1717_v28 }
 0x8f4   :  { %2737 = vpow2.f32 %v1967_v29 }
 0x8f5   :  { %2739 = vpow2.f32 %v1968_v30 }
 0x8f6   :  { %2741 = vpow2.f32 %v1969_v32 }
 0x8f7   :  { %2743 = vtanh.f32 %v1785_v24 }
 0x8fe   :  { %v2738_v33 = vpop.eup %2737 }
 0x8ff   :  { %v2740_v37 = vpop.eup %2739  ;;  %v1796_v38 = vadd.f32 1.0, %v2738_v33 }
 0x900   :  { %v1797_v42 = vadd.f32 1.0, %v2740_v37  ;;  %v2742_v43 = vpop.eup %2741 }
 0x901   :  { %2745 = vrcp.f32 %v1796_v38  ;;  %v2744_v27 = vpop.eup %2743  ;;  %v1805_v40 = vadd.f32 1.0, %v2742_v43 }
 0x902   :  { %2747 = vrcp.f32 %v1797_v42 }
 0x903   :  { %2749 = vrcp.f32 %v1805_v40 }
 0x90b   :  { %v2746_v16 = vpop.eup %2745 }
 0x90c   :  { %v2748_v31 = vpop.eup %2747  ;;  %v1810_v35 = vmul.f32 %v2746_v16, %v2744_v27 }
 0x90d   :  { %v1809_v20 = vmul.f32 %v2748_v31, %v3309_v26  ;;  %v2750_v44 = vpop.eup %2749 }
 0x90f   :  { %v1811_v41 = vadd.f32 %v1810_v35, %v1809_v20 }
 0x911   :  { %2751 = vtanh.f32 %v1811_v41 }
 0x91b   :  { %v2752_v48 = vpop.eup %2751 }
 0x91c   :  { %v1813_v53 = vmul.f32 %v2752_v48, %v2750_v44 }
 0x91e   :  { %v1814_v54 = vsel %vm359_vm1, %v3312_v39, %v1813_v53 }
 0x91f   :  { %2021 = vmatmul.mubr.f32.vlgmr.msra.gmra.mrb[18].mxu0 %v1814_v54 }
 0x9f2   :  { %v1904_v61 = vpop.f32.mrb[18].mxu0 }
 0x9f3   :  { %v1905_v3 = vadd.f32 %v1970_v57, %v1904_v61  ;;  %v2022_v4 = vpop.f32.mrb[19].mxu0 }
 0x9f5   :  { %1908 = vmax.xlane.f32.xlu0 %v1905_v3 }
 0xa82   :  { %v1909_v7 = vpop.xlane.xlu0 %1908 }
 0xa83   :  { %v1910_v11 = vsub.f32 %v1905_v3, %v1909_v7 }
 0xa85   :  { %v1911_v17 = vmul.f32 1.442695, %v1910_v11 }
 0xa87   :  { %2753 = vpow2.f32 %v1911_v17 }
 0xa91   :  { %v2754_v18 = vpop.eup %2753 }
 0xa92   :  { %1913 = vadd.xlane.f32.xlu0 %v2754_v18 }
 0xb1f   :  { %v1914_v21 = vpop.xlane.xlu0 %1913 }
 0xb20   :  { %2755 = vrcp.f32 %v1914_v21 }
 0xb2a   :  { %v2756_v26 = vpop.eup %2755 }
 0xb2b   :  { %v1916_v60 = vmul.f32 %v2756_v26, %v2754_v18 }
 0xb2d   :  { %1917 = vst [vmem:[%s3382_s5] sm:$0xff] %v1916_v60 }
 0xb2e   :  { %1922 = vsyncpa [#allocation4], 1 }

</bundles_post_ra>
